<compile_context>
chip_gen: v6e
topology: v6e:2x2x1
jax: 0.10.0
libtpu: 0.0.40
codegen_flags: <defaults>
</compile_context>

<pallas_src>
import functools

import jax
import jax.numpy as jnp
from jax.experimental import pallas as pl
from jax.experimental.pallas import tpu as pltpu

_BIG = 1.0e9          # "no opposite-class pixel" sentinel; must exceed any real d2
_PAD_COORD = 1.0e6    # padded-pixel coordinate: d2(pad, real) ~ 1e12 > _BIG
_PAD_LOGIT = -100.0   # sigmoid(-100) ~ 0 -> padded err ~ 0


def _round_up(x, m):
    return ((x + m - 1) // m) * m


def _vmem_capacity_bytes():
    try:
        return int(getattr(pltpu.get_tpu_info(), "vmem_capacity_bytes",
                           64 * 1024 * 1024))
    except Exception:
        return 64 * 1024 * 1024


def _hausdorff_kernel(rows_ref, cols_ref, out_ref, minp_ref, mint_ref, *, B, alpha):
    """rows_ref: (2B+2, Ncol) lane slice; cols_ref: (chunk, 2B+2) candidate slab."""
    c = pl.program_id(1)

    @pl.when(c == 0)
    def _init():
        minp_ref[...] = jnp.full(minp_ref.shape, _BIG, jnp.float32)
        mint_ref[...] = jnp.full(mint_ref.shape, _BIG, jnp.float32)

    # Candidate ("a") coordinates for this chunk: static lane slices of the
    # wrapper-transposed block -> already sublane-major, no relayout needed.
    xa = cols_ref[:, pl.ds(2 * B, 1)]          # (chunk, 1)
    ya = cols_ref[:, pl.ds(2 * B + 1, 1)]
    # Target ("b") coordinates for this lane slice.
    xb = rows_ref[pl.ds(2 * B, 1), :]          # (1, Ncol)
    yb = rows_ref[pl.ds(2 * B + 1, 1), :]
    dx = xa - xb
    dy = ya - yb
    d2 = dx * dx + dy * dy                     # (chunk, Ncol); shared by batches + fields

    for b in range(B):                         # static unroll; d2 reused across batches
        # fg masks: sigmoid(x) > 0.5  <=>  x > 0 (no sigmoid needed for the mask).
        fgp_a = (cols_ref[:, pl.ds(b, 1)] > 0.0).astype(jnp.float32)        # (chunk, 1)
        fgt_a = (cols_ref[:, pl.ds(B + b, 1)] > 0.5).astype(jnp.float32)
        fgp_b = (rows_ref[pl.ds(b, 1), :] > 0.0).astype(jnp.float32)        # (1, Ncol)
        fgt_b = (rows_ref[pl.ds(B + b, 1), :] > 0.5).astype(jnp.float32)

        d2p = jnp.where(fgp_a != fgp_b, d2, _BIG)
        d2t = jnp.where(fgt_a != fgt_b, d2, _BIG)
        # chunk -> 1 sublane min rides the idle XLU slot of this VALU-bound loop.
        minp_ref[pl.ds(b, 1), :] = jnp.minimum(
            minp_ref[pl.ds(b, 1), :], jnp.min(d2p, axis=0, keepdims=True))
        mint_ref[pl.ds(b, 1), :] = jnp.minimum(
            mint_ref[pl.ds(b, 1), :], jnp.min(d2t, axis=0, keepdims=True))

    @pl.when(c == pl.num_programs(1) - 1)
    def _finalize():
        total = jnp.float32(0.0)
        for b in range(B):
            p = jax.nn.sigmoid(rows_ref[pl.ds(b, 1), :])
            t = rows_ref[pl.ds(B + b, 1), :]
            mp = minp_ref[pl.ds(b, 1), :]
            mt = mint_ref[pl.ds(b, 1), :]
            if alpha == 2.0:
                # dt**2 == min squared distance; skip the sqrt entirely.
                dist = (jnp.where(mp < _BIG, mp, 0.0)
                        + jnp.where(mt < _BIG, mt, 0.0))
            else:
                # TODO(synk): matches the reference dt**alpha; alpha <= 0 inherits
                # the reference's 0**alpha = 1/inf behaviour.
                pdt = jnp.where(mp < _BIG, jnp.sqrt(mp), 0.0)
                tdt = jnp.where(mt < _BIG, jnp.sqrt(mt), 0.0)
                dist = pdt ** alpha + tdt ** alpha
            err = (p - t) ** 2
            total = total + jnp.sum(err * dist)
        # TODO(synk): all-one-class images return a 0 distance field (the _BIG
        # sentinel path); matches the in-file reference, not scipy's edt on an
        # all-ones mask.
        out_ref[...] = jnp.full(out_ref.shape, total, jnp.float32)


def hausdorff_dt_loss(pred, target, alpha=2.0):
    """pred, target: (B, 1, H, W); pred holds logits.  Returns the scalar loss."""
    assert pred.ndim == 4 and pred.shape[1] == 1, "only (B, 1, H, W) supported"
    assert pred.shape == target.shape
    B, C, H, W = pred.shape
    N = H * W
    assert (H - 1) ** 2 + (W - 1) ** 2 < _BIG, "image too large for the _BIG sentinel"

    # --- lane split (megacore coverage + bounded Ncol) -------------------------
    MAX_NCOL = 32768
    n_split = max(2, -(-N // MAX_NCOL))
    lane_align = 128 * n_split
    N_pad = _round_up(N, lane_align)
    Ncol = N_pad // n_split

    # --- generation-aware chunk / VMEM budget ----------------------------------
    vmem_cap = _vmem_capacity_bytes()
    if vmem_cap <= 96 * 1024 * 1024:      # v7x-class: 64 MiB physical per core
        temp_budget = 20 * 1024 * 1024
        limit_cap = 40 * 1024 * 1024
    else:                                 # v5e / v6e: 128 MiB per core
        temp_budget = 56 * 1024 * 1024
        limit_cap = 100 * 1024 * 1024
    # ~6 live (chunk, Ncol) f32 temporaries during one sweep step.
    chunk = temp_budget // (6 * 4 * Ncol)
    chunk = max(8, min(chunk - chunk % 8, 4096, N_pad))
    while chunk > 8 and N_pad % chunk != 0:
        chunk -= 8                        # 8 always divides N_pad -> terminates safely
    num_chunks = N_pad // chunk

    # --- operand packing --------------------------------------------------------
    pad = N_pad - N
    predf = pred.reshape(B, N).astype(jnp.float32)
    tgtf = target.reshape(B, N).astype(jnp.float32)
    predp = jnp.pad(predf, ((0, 0), (0, pad)), constant_values=_PAD_LOGIT)
    tgtp = jnp.pad(tgtf, ((0, 0), (0, pad)), constant_values=0.0)
    idx = jnp.arange(N_pad, dtype=jnp.int32)
    xs = jnp.where(idx < N, (idx // W).astype(jnp.float32), _PAD_COORD)
    ys = jnp.where(idx < N, (idx % W).astype(jnp.float32), _PAD_COORD)
    # rows: lane-dense per-pixel data [pred_0..pred_{B-1}, tgt_0..tgt_{B-1}, xs, ys]
    rows = jnp.concatenate([predp, tgtp, xs[None, :], ys[None, :]], axis=0)
    # cols: same data transposed once in XLA -> candidate-axis (sublane-major) view;
    # replaces the former 128x-padded (N, 1) VMEM buffers.
    cols = rows.T

    R = 2 * B + 2
    fixed = (R * Ncol * 4 * 2                       # rows block, double-buffered
             + chunk * max(R, 128) * 4 * 2          # cols block (lane padded), 2-buffered
             + 2 * _round_up(B, 8) * Ncol * 4       # min accumulators
             + 8 * 128 * 4 * 2)                     # output block
    temps = 6 * chunk * Ncol * 4
    vmem_limit = int(min(limit_cap,
                         max(32 * 1024 * 1024, temps + fixed + 4 * 1024 * 1024)))

    kernel = functools.partial(_hausdorff_kernel, B=B, alpha=alpha)
    partials = pl.pallas_call(
        kernel,
        out_shape=jax.ShapeDtypeStruct((n_split, 8, 128), jnp.float32),
        grid_spec=pltpu.PrefetchScalarGridSpec(
            num_scalar_prefetch=0,
            grid=(n_split, num_chunks),
            in_specs=[
                pl.BlockSpec((R, Ncol), lambda j, c: (0, j)),     # rows: lane slice j
                pl.BlockSpec((chunk, R), lambda j, c: (c, 0)),    # cols: candidate chunk c
            ],
            out_specs=pl.BlockSpec((1, 8, 128), lambda j, c: (j, 0, 0)),
            scratch_shapes=[
                pltpu.VMEM((B, Ncol), jnp.float32),   # running min d2 (pred field)
                pltpu.VMEM((B, Ncol), jnp.float32),   # running min d2 (target field)
            ],
        ),
        compiler_params=pltpu.CompilerParams(
            dimension_semantics=("parallel", "arbitrary"),
            vmem_limit_bytes=vmem_limit,
        ),
    )(rows, cols)

    total = jnp.sum(partials[:, 0, 0])
    return total / (B * C * H * W)


def reference_loss(pred, target, alpha=2.0):
    """Plain-JAX reference with identical brute-force EDT semantics."""
    B, C, H, W = pred.shape
    N = H * W
    p = jax.nn.sigmoid(pred).reshape(B, N)
    t = target.reshape(B, N).astype(jnp.float32)
    xs = (jnp.arange(N) // W).astype(jnp.float32)
    ys = (jnp.arange(N) % W).astype(jnp.float32)
    d2 = (xs[:, None] - xs[None, :]) ** 2 + (ys[:, None] - ys[None, :]) ** 2

    def field(fg):
        opp = fg[:, None] != fg[None, :]
        mind2 = jnp.min(jnp.where(opp, d2, _BIG), axis=0)
        return jnp.where(mind2 < _BIG, jnp.sqrt(mind2), 0.0)

    pdt = jax.vmap(field)(p > 0.5)
    tdt = jax.vmap(field)(t > 0.5)
    err = (p - t) ** 2
    dist = pdt * pdt + tdt * tdt if alpha == 2.0 else pdt ** alpha + tdt ** alpha
    return jnp.mean(err * dist)


if __name__ == "__main__":
    key = jax.random.PRNGKey(0)
    k1, k2 = jax.random.split(key)
    B, C, H, W = 2, 1, 16, 16
    pred = jax.random.normal(k1, (B, C, H, W), dtype=jnp.float32)            # logits
    target = (jax.random.uniform(k2, (B, C, H, W)) < 0.4).astype(jnp.float32)

    loss = jax.block_until_ready(hausdorff_dt_loss(pred, target, alpha=2.0))
    ref = jax.block_until_ready(reference_loss(pred, target, alpha=2.0))
    assert jnp.allclose(loss, ref, rtol=1e-3, atol=1e-5), (loss, ref)

    print("KERNEL_OK")
</pallas_src>

<mosaic_0001>
module attributes {stable_mosaic.version = 11 : i64} {
  func.func @_hausdorff_kernel(%arg0: i32, %arg1: i32, %arg2: memref<6x128xf32, #tpu.memory_space<vmem>>, %arg3: memref<256x6xf32, #tpu.memory_space<vmem>>, %arg4: memref<1x8x128xf32, #tpu.memory_space<vmem>>, %arg5: memref<2x128xf32, #tpu.memory_space<vmem>>, %arg6: memref<2x128xf32, #tpu.memory_space<vmem>>) attributes {dimension_semantics = [#tpu.dimension_semantics<parallel>, #tpu.dimension_semantics<arbitrary>], iteration_bounds = array<i64: 2, 1>, scalar_prefetch = 0 : i64, scratch_operands = 2 : i64, tpu.core_type = #tpu.core_type<tc>, window_params = [{transform_indices = @transform_0, window_bounds = array<i64: 6, 128>}, {transform_indices = @transform_1, window_bounds = array<i64: 256, 6>}, {transform_indices = @transform_2, window_bounds = array<i64: 1, 8, 128>}]} {
    %c0_i32 = arith.constant 0 : i32
    %0 = arith.cmpi eq, %arg1, %c0_i32 : i32
    %1 = arith.extui %0 : i1 to i32
    %c0_i32_0 = arith.constant 0 : i32
    %2 = arith.cmpi ne, %1, %c0_i32_0 : i32
    scf.if %2 {
      %cst_52 = arith.constant 1.000000e+09 : f32
      %99 = vector.broadcast %cst_52 : f32 to vector<2x128xf32>
      %c0_53 = arith.constant 0 : index
      %c0_54 = arith.constant 0 : index
      %100 = vector.load %arg5[%c0_53, %c0_54] : memref<2x128xf32, #tpu.memory_space<vmem>>, vector<2x128xf32>
      tpu.vector_store %arg5[%c0_53, %c0_54], %99 {strides = array<i32>} : memref<2x128xf32, #tpu.memory_space<vmem>>, vector<2x128xf32>,
      %cst_55 = arith.constant 1.000000e+09 : f32
      %101 = vector.broadcast %cst_55 : f32 to vector<2x128xf32>
      %c0_56 = arith.constant 0 : index
      %c0_57 = arith.constant 0 : index
      %102 = vector.load %arg6[%c0_56, %c0_57] : memref<2x128xf32, #tpu.memory_space<vmem>>, vector<2x128xf32>
      tpu.vector_store %arg6[%c0_56, %c0_57], %101 {strides = array<i32>} : memref<2x128xf32, #tpu.memory_space<vmem>>, vector<2x128xf32>,
    } else {
    }
    %c0 = arith.constant 0 : index
    %c4 = arith.constant 4 : index
    %3 = vector.load %arg3[%c0, %c4] : memref<256x6xf32, #tpu.memory_space<vmem>>, vector<256x1xf32>
    %c0_1 = arith.constant 0 : index
    %c5 = arith.constant 5 : index
    %4 = vector.load %arg3[%c0_1, %c5] : memref<256x6xf32, #tpu.memory_space<vmem>>, vector<256x1xf32>
    %c4_2 = arith.constant 4 : index
    %c0_3 = arith.constant 0 : index
    %5 = vector.load %arg2[%c4_2, %c0_3] : memref<6x128xf32, #tpu.memory_space<vmem>>, vector<1x128xf32>
    %c5_4 = arith.constant 5 : index
    %c0_5 = arith.constant 0 : index
    %6 = vector.load %arg2[%c5_4, %c0_5] : memref<6x128xf32, #tpu.memory_space<vmem>>, vector<1x128xf32>
    %7 = vector.broadcast %3 : vector<256x1xf32> to vector<256x128xf32>
    %8 = vector.broadcast %5 : vector<1x128xf32> to vector<256x128xf32>
    %9 = arith.subf %7, %8 : vector<256x128xf32>
    %10 = vector.broadcast %4 : vector<256x1xf32> to vector<256x128xf32>
    %11 = vector.broadcast %6 : vector<1x128xf32> to vector<256x128xf32>
    %12 = arith.subf %10, %11 : vector<256x128xf32>
    %13 = arith.mulf %9, %9 : vector<256x128xf32>
    %14 = arith.mulf %12, %12 : vector<256x128xf32>
    %15 = arith.addf %13, %14 : vector<256x128xf32>
    %c0_6 = arith.constant 0 : index
    %c0_7 = arith.constant 0 : index
    %16 = vector.load %arg3[%c0_6, %c0_7] : memref<256x6xf32, #tpu.memory_space<vmem>>, vector<256x1xf32>
    %cst = arith.constant 0.000000e+00 : f32
    %17 = vector.broadcast %cst : f32 to vector<256x1xf32>
    %18 = arith.cmpf ogt, %16, %17 : vector<256x1xf32>
    %19 = arith.extui %18 : vector<256x1xi1> to vector<256x1xi32>
    %20 = arith.sitofp %19 : vector<256x1xi32> to vector<256x1xf32>
    %c0_8 = arith.constant 0 : index
    %c2 = arith.constant 2 : index
    %21 = vector.load %arg3[%c0_8, %c2] : memref<256x6xf32, #tpu.memory_space<vmem>>, vector<256x1xf32>
    %cst_9 = arith.constant 5.000000e-01 : f32
    %22 = vector.broadcast %cst_9 : f32 to vector<256x1xf32>
    %23 = arith.cmpf ogt, %21, %22 : vector<256x1xf32>
    %24 = arith.extui %23 : vector<256x1xi1> to vector<256x1xi32>
    %25 = arith.sitofp %24 : vector<256x1xi32> to vector<256x1xf32>
    %c0_10 = arith.constant 0 : index
    %c0_11 = arith.constant 0 : index
    %26 = vector.load %arg2[%c0_10, %c0_11] : memref<6x128xf32, #tpu.memory_space<vmem>>, vector<1x128xf32>
    %cst_12 = arith.constant 0.000000e+00 : f32
    %27 = vector.broadcast %cst_12 : f32 to vector<1x128xf32>
    %28 = arith.cmpf ogt, %26, %27 : vector<1x128xf32>
    %29 = arith.extui %28 : vector<1x128xi1> to vector<1x128xi32>
    %30 = arith.sitofp %29 : vector<1x128xi32> to vector<1x128xf32>
    %c2_13 = arith.constant 2 : index
    %c0_14 = arith.constant 0 : index
    %31 = vector.load %arg2[%c2_13, %c0_14] : memref<6x128xf32, #tpu.memory_space<vmem>>, vector<1x128xf32>
    %cst_15 = arith.constant 5.000000e-01 : f32
    %32 = vector.broadcast %cst_15 : f32 to vector<1x128xf32>
    %33 = arith.cmpf ogt, %31, %32 : vector<1x128xf32>
    %34 = arith.extui %33 : vector<1x128xi1> to vector<1x128xi32>
    %35 = arith.sitofp %34 : vector<1x128xi32> to vector<1x128xf32>
    %36 = vector.broadcast %20 : vector<256x1xf32> to vector<256x128xf32>
    %37 = vector.broadcast %30 : vector<1x128xf32> to vector<256x128xf32>
    %38 = arith.cmpf one, %36, %37 : vector<256x128xf32>
    %cst_16 = arith.constant 1.000000e+09 : f32
    %39 = vector.broadcast %cst_16 : f32 to vector<256x128xf32>
    %40 = arith.select %38, %15, %39 : vector<256x128xi1>, vector<256x128xf32>
    %41 = vector.broadcast %25 : vector<256x1xf32> to vector<256x128xf32>
    %42 = vector.broadcast %35 : vector<1x128xf32> to vector<256x128xf32>
    %43 = arith.cmpf one, %41, %42 : vector<256x128xf32>
    %cst_17 = arith.constant 1.000000e+09 : f32
    %44 = vector.broadcast %cst_17 : f32 to vector<256x128xf32>
    %45 = arith.select %43, %15, %44 : vector<256x128xi1>, vector<256x128xf32>
    %c0_18 = arith.constant 0 : index
    %c0_19 = arith.constant 0 : index
    %46 = vector.load %arg5[%c0_18, %c0_19] : memref<2x128xf32, #tpu.memory_space<vmem>>, vector<1x128xf32>
    %cst_20 = arith.constant dense<0x7F800000> : vector<128xf32>
    %47 = vector.multi_reduction <minimumf>, %40, %cst_20 [0] : vector<256x128xf32> to vector<128xf32>
    %48 = vector.shape_cast %47 : vector<128xf32> to vector<1x128xf32>
    %49 = arith.minimumf %46, %48 : vector<1x128xf32>
    %c0_21 = arith.constant 0 : index
    %c0_22 = arith.constant 0 : index
    %50 = vector.load %arg5[%c0_21, %c0_22] : memref<2x128xf32, #tpu.memory_space<vmem>>, vector<1x128xf32>
    tpu.vector_store %arg5[%c0_21, %c0_22], %49 {strides = array<i32>} : memref<2x128xf32, #tpu.memory_space<vmem>>, vector<1x128xf32>,
    %c0_23 = arith.constant 0 : index
    %c0_24 = arith.constant 0 : index
    %51 = vector.load %arg6[%c0_23, %c0_24] : memref<2x128xf32, #tpu.memory_space<vmem>>, vector<1x128xf32>
    %cst_25 = arith.constant dense<0x7F800000> : vector<128xf32>
    %52 = vector.multi_reduction <minimumf>, %45, %cst_25 [0] : vector<256x128xf32> to vector<128xf32>
    %53 = vector.shape_cast %52 : vector<128xf32> to vector<1x128xf32>
    %54 = arith.minimumf %51, %53 : vector<1x128xf32>
    %c0_26 = arith.constant 0 : index
    %c0_27 = arith.constant 0 : index
    %55 = vector.load %arg6[%c0_26, %c0_27] : memref<2x128xf32, #tpu.memory_space<vmem>>, vector<1x128xf32>
    tpu.vector_store %arg6[%c0_26, %c0_27], %54 {strides = array<i32>} : memref<2x128xf32, #tpu.memory_space<vmem>>, vector<1x128xf32>,
    %c0_28 = arith.constant 0 : index
    %c1 = arith.constant 1 : index
    %56 = vector.load %arg3[%c0_28, %c1] : memref<256x6xf32, #tpu.memory_space<vmem>>, vector<256x1xf32>
    %cst_29 = arith.constant 0.000000e+00 : f32
    %57 = vector.broadcast %cst_29 : f32 to vector<256x1xf32>
    %58 = arith.cmpf ogt, %56, %57 : vector<256x1xf32>
    %59 = arith.extui %58 : vector<256x1xi1> to vector<256x1xi32>
    %60 = arith.sitofp %59 : vector<256x1xi32> to vector<256x1xf32>
    %c0_30 = arith.constant 0 : index
    %c3 = arith.constant 3 : index
    %61 = vector.load %arg3[%c0_30, %c3] : memref<256x6xf32, #tpu.memory_space<vmem>>, vector<256x1xf32>
    %cst_31 = arith.constant 5.000000e-01 : f32
    %62 = vector.broadcast %cst_31 : f32 to vector<256x1xf32>
    %63 = arith.cmpf ogt, %61, %62 : vector<256x1xf32>
    %64 = arith.extui %63 : vector<256x1xi1> to vector<256x1xi32>
    %65 = arith.sitofp %64 : vector<256x1xi32> to vector<256x1xf32>
    %c1_32 = arith.constant 1 : index
    %c0_33 = arith.constant 0 : index
    %66 = vector.load %arg2[%c1_32, %c0_33] : memref<6x128xf32, #tpu.memory_space<vmem>>, vector<1x128xf32>
    %cst_34 = arith.constant 0.000000e+00 : f32
    %67 = vector.broadcast %cst_34 : f32 to vector<1x128xf32>
    %68 = arith.cmpf ogt, %66, %67 : vector<1x128xf32>
    %69 = arith.extui %68 : vector<1x128xi1> to vector<1x128xi32>
    %70 = arith.sitofp %69 : vector<1x128xi32> to vector<1x128xf32>
    %c3_35 = arith.constant 3 : index
    %c0_36 = arith.constant 0 : index
    %71 = vector.load %arg2[%c3_35, %c0_36] : memref<6x128xf32, #tpu.memory_space<vmem>>, vector<1x128xf32>
    %cst_37 = arith.constant 5.000000e-01 : f32
    %72 = vector.broadcast %cst_37 : f32 to vector<1x128xf32>
    %73 = arith.cmpf ogt, %71, %72 : vector<1x128xf32>
    %74 = arith.extui %73 : vector<1x128xi1> to vector<1x128xi32>
    %75 = arith.sitofp %74 : vector<1x128xi32> to vector<1x128xf32>
    %76 = vector.broadcast %60 : vector<256x1xf32> to vector<256x128xf32>
    %77 = vector.broadcast %70 : vector<1x128xf32> to vector<256x128xf32>
    %78 = arith.cmpf one, %76, %77 : vector<256x128xf32>
    %cst_38 = arith.constant 1.000000e+09 : f32
    %79 = vector.broadcast %cst_38 : f32 to vector<256x128xf32>
    %80 = arith.select %78, %15, %79 : vector<256x128xi1>, vector<256x128xf32>
    %81 = vector.broadcast %65 : vector<256x1xf32> to vector<256x128xf32>
    %82 = vector.broadcast %75 : vector<1x128xf32> to vector<256x128xf32>
    %83 = arith.cmpf one, %81, %82 : vector<256x128xf32>
    %cst_39 = arith.constant 1.000000e+09 : f32
    %84 = vector.broadcast %cst_39 : f32 to vector<256x128xf32>
    %85 = arith.select %83, %15, %84 : vector<256x128xi1>, vector<256x128xf32>
    %c1_40 = arith.constant 1 : index
    %c0_41 = arith.constant 0 : index
    %86 = vector.load %arg5[%c1_40, %c0_41] : memref<2x128xf32, #tpu.memory_space<vmem>>, vector<1x128xf32>
    %cst_42 = arith.constant dense<0x7F800000> : vector<128xf32>
    %87 = vector.multi_reduction <minimumf>, %80, %cst_42 [0] : vector<256x128xf32> to vector<128xf32>
    %88 = vector.shape_cast %87 : vector<128xf32> to vector<1x128xf32>
    %89 = arith.minimumf %86, %88 : vector<1x128xf32>
    %c1_43 = arith.constant 1 : index
    %c0_44 = arith.constant 0 : index
    %90 = vector.load %arg5[%c1_43, %c0_44] : memref<2x128xf32, #tpu.memory_space<vmem>>, vector<1x128xf32>
    tpu.vector_store %arg5[%c1_43, %c0_44], %89 {strides = array<i32>} : memref<2x128xf32, #tpu.memory_space<vmem>>, vector<1x128xf32>,
    %c1_45 = arith.constant 1 : index
    %c0_46 = arith.constant 0 : index
    %91 = vector.load %arg6[%c1_45, %c0_46] : memref<2x128xf32, #tpu.memory_space<vmem>>, vector<1x128xf32>
    %cst_47 = arith.constant dense<0x7F800000> : vector<128xf32>
    %92 = vector.multi_reduction <minimumf>, %85, %cst_47 [0] : vector<256x128xf32> to vector<128xf32>
    %93 = vector.shape_cast %92 : vector<128xf32> to vector<1x128xf32>
    %94 = arith.minimumf %91, %93 : vector<1x128xf32>
    %c1_48 = arith.constant 1 : index
    %c0_49 = arith.constant 0 : index
    %95 = vector.load %arg6[%c1_48, %c0_49] : memref<2x128xf32, #tpu.memory_space<vmem>>, vector<1x128xf32>
    tpu.vector_store %arg6[%c1_48, %c0_49], %94 {strides = array<i32>} : memref<2x128xf32, #tpu.memory_space<vmem>>, vector<1x128xf32>,
    %c0_i32_50 = arith.constant 0 : i32
    %96 = arith.cmpi eq, %arg1, %c0_i32_50 : i32
    %97 = arith.extui %96 : i1 to i32
    %c0_i32_51 = arith.constant 0 : i32
    %98 = arith.cmpi ne, %97, %c0_i32_51 : i32
    scf.if %98 {
      %c0_52 = arith.constant 0 : index
      %c0_53 = arith.constant 0 : index
      %99 = vector.load %arg2[%c0_52, %c0_53] : memref<6x128xf32, #tpu.memory_space<vmem>>, vector<1x128xf32>
      %100 = arith.negf %99 : vector<1x128xf32>
      %101 = math.exp %100 : vector<1x128xf32>
      %cst_54 = arith.constant 1.000000e+00 : f32
      %102 = vector.broadcast %cst_54 : f32 to vector<1x128xf32>
      %103 = arith.addf %102, %101 : vector<1x128xf32>
      %104 = arith.divf %102, %103 : vector<1x128xf32>
      %c2_55 = arith.constant 2 : index
      %c0_56 = arith.constant 0 : index
      %105 = vector.load %arg2[%c2_55, %c0_56] : memref<6x128xf32, #tpu.memory_space<vmem>>, vector<1x128xf32>
      %c0_57 = arith.constant 0 : index
      %c0_58 = arith.constant 0 : index
      %106 = vector.load %arg5[%c0_57, %c0_58] : memref<2x128xf32, #tpu.memory_space<vmem>>, vector<1x128xf32>
      %c0_59 = arith.constant 0 : index
      %c0_60 = arith.constant 0 : index
      %107 = vector.load %arg6[%c0_59, %c0_60] : memref<2x128xf32, #tpu.memory_space<vmem>>, vector<1x128xf32>
      %cst_61 = arith.constant 1.000000e+09 : f32
      %108 = vector.broadcast %cst_61 : f32 to vector<1x128xf32>
      %109 = arith.cmpf olt, %106, %108 : vector<1x128xf32>
      %cst_62 = arith.constant 0.000000e+00 : f32
      %110 = vector.broadcast %cst_62 : f32 to vector<1x128xf32>
      %111 = arith.select %109, %106, %110 : vector<1x128xi1>, vector<1x128xf32>
      %cst_63 = arith.constant 1.000000e+09 : f32
      %112 = vector.broadcast %cst_63 : f32 to vector<1x128xf32>
      %113 = arith.cmpf olt, %107, %112 : vector<1x128xf32>
      %cst_64 = arith.constant 0.000000e+00 : f32
      %114 = vector.broadcast %cst_64 : f32 to vector<1x128xf32>
      %115 = arith.select %113, %107, %114 : vector<1x128xi1>, vector<1x128xf32>
      %116 = arith.addf %111, %115 : vector<1x128xf32>
      %117 = arith.subf %104, %105 : vector<1x128xf32>
      %118 = arith.mulf %117, %117 : vector<1x128xf32>
      %119 = arith.mulf %118, %116 : vector<1x128xf32>
      %120 = vector.shape_cast %119 : vector<1x128xf32> to vector<1x1x128xf32>
      %cst_65 = arith.constant dense<0.000000e+00> : vector<1xf32>
      %121 = vector.multi_reduction <add>, %120, %cst_65 [1, 2] : vector<1x1x128xf32> to vector<1xf32>
      %122 = vector.shape_cast %121 : vector<1xf32> to vector<1x1x1xf32>
      %123 = vector.extract %122[0, 0, 0] : f32 from vector<1x1x1xf32>
      %cst_66 = arith.constant 0.000000e+00 : f32
      %124 = arith.addf %cst_66, %123 : f32
      %c1_67 = arith.constant 1 : index
      %c0_68 = arith.constant 0 : index
      %125 = vector.load %arg2[%c1_67, %c0_68] : memref<6x128xf32, #tpu.memory_space<vmem>>, vector<1x128xf32>
      %126 = arith.negf %125 : vector<1x128xf32>
      %127 = math.exp %126 : vector<1x128xf32>
      %cst_69 = arith.constant 1.000000e+00 : f32
      %128 = vector.broadcast %cst_69 : f32 to vector<1x128xf32>
      %129 = arith.addf %128, %127 : vector<1x128xf32>
      %130 = arith.divf %128, %129 : vector<1x128xf32>
      %c3_70 = arith.constant 3 : index
      %c0_71 = arith.constant 0 : index
      %131 = vector.load %arg2[%c3_70, %c0_71] : memref<6x128xf32, #tpu.memory_space<vmem>>, vector<1x128xf32>
      %c1_72 = arith.constant 1 : index
      %c0_73 = arith.constant 0 : index
      %132 = vector.load %arg5[%c1_72, %c0_73] : memref<2x128xf32, #tpu.memory_space<vmem>>, vector<1x128xf32>
      %c1_74 = arith.constant 1 : index
      %c0_75 = arith.constant 0 : index
      %133 = vector.load %arg6[%c1_74, %c0_75] : memref<2x128xf32, #tpu.memory_space<vmem>>, vector<1x128xf32>
      %cst_76 = arith.constant 1.000000e+09 : f32
      %134 = vector.broadcast %cst_76 : f32 to vector<1x128xf32>
      %135 = arith.cmpf olt, %132, %134 : vector<1x128xf32>
      %cst_77 = arith.constant 0.000000e+00 : f32
      %136 = vector.broadcast %cst_77 : f32 to vector<1x128xf32>
      %137 = arith.select %135, %132, %136 : vector<1x128xi1>, vector<1x128xf32>
      %cst_78 = arith.constant 1.000000e+09 : f32
      %138 = vector.broadcast %cst_78 : f32 to vector<1x128xf32>
      %139 = arith.cmpf olt, %133, %138 : vector<1x128xf32>
      %cst_79 = arith.constant 0.000000e+00 : f32
      %140 = vector.broadcast %cst_79 : f32 to vector<1x128xf32>
      %141 = arith.select %139, %133, %140 : vector<1x128xi1>, vector<1x128xf32>
      %142 = arith.addf %137, %141 : vector<1x128xf32>
      %143 = arith.subf %130, %131 : vector<1x128xf32>
      %144 = arith.mulf %143, %143 : vector<1x128xf32>
      %145 = arith.mulf %144, %142 : vector<1x128xf32>
      %146 = vector.shape_cast %145 : vector<1x128xf32> to vector<1x1x128xf32>
      %cst_80 = arith.constant dense<0.000000e+00> : vector<1xf32>
      %147 = vector.multi_reduction <add>, %146, %cst_80 [1, 2] : vector<1x1x128xf32> to vector<1xf32>
      %148 = vector.shape_cast %147 : vector<1xf32> to vector<1x1x1xf32>
      %149 = vector.extract %148[0, 0, 0] : f32 from vector<1x1x1xf32>
      %150 = arith.addf %124, %149 : f32
      %151 = vector.broadcast %150 : f32 to vector<1x8x128xf32>
      %c0_81 = arith.constant 0 : index
      %c0_82 = arith.constant 0 : index
      %c0_83 = arith.constant 0 : index
      %152 = vector.load %arg4[%c0_81, %c0_82, %c0_83] : memref<1x8x128xf32, #tpu.memory_space<vmem>>, vector<1x8x128xf32>
      tpu.vector_store %arg4[%c0_81, %c0_82, %c0_83], %151 {strides = array<i32>} : memref<1x8x128xf32, #tpu.memory_space<vmem>>, vector<1x8x128xf32>,
    } else {
    }
    return
  }
  func.func @transform_0(%arg0: i32, %arg1: i32) -> (i32, i32) {
    %c0_i32 = arith.constant 0 : i32
    %c0_i32_0 = arith.constant 0 : i32
    return %c0_i32, %arg0 : i32, i32
  }
  func.func @transform_1(%arg0: i32, %arg1: i32) -> (i32, i32) {
    %c0_i32 = arith.constant 0 : i32
    %c0_i32_0 = arith.constant 0 : i32
    return %arg1, %c0_i32 : i32, i32
  }
  func.func @transform_2(%arg0: i32, %arg1: i32) -> (i32, i32, i32) {
    %c0_i32 = arith.constant 0 : i32
    %c0_i32_0 = arith.constant 0 : i32
    %c0_i32_1 = arith.constant 0 : i32
    return %arg0, %c0_i32, %c0_i32_0 : i32, i32, i32
  }
}

</mosaic_0001>

<bundles_post_ra>
// kernel: tpu_custom_call.1
= control target key start
LH: loop header
LB: loop body
LE: loop exit
PB: predicated region body
PF: predicated region fallthrough
CT: control target
= control target key end

     0   :  { %7 = vsyncpa [#allocation5], 0  ;;  %s5079_s0 = inlined_call_operand.vmem [shape: f32[6,256], index: 0, kind: input, shape index: {}]   ;;  %s5080_s1 = inlined_call_operand.vmem [shape: f32[256,6], index: 1, kind: input, shape index: {}]   ;;  %s5081_s2 = inlined_call_operand.hbm [shape: f32[2,8,128], index: 2, kind: output, shape index: {}]  }
   0x1   :  { %9 = vsyncpa [#allocation5 + $0x1], 0  ;;  %s3002_s9 = smov 0   ;;  %s3004_s10 = smov 0  }
   0x2   :  { %s3006_s11 = smov 0   ;;  %s3008_s12 = smov 0  }
   0x3   :  { %s3010_s13 = smov 0   ;;  %s3012_s14 = smov 0  }
   0x4 LB: > { %s2333_s15 = sadd.s32 4294967295, %s2976_s14   ;;  %s2334_s16 = sadd.s32 4294967294, %s2976_s14   ;;  %s2976_s14 = sphi %s3012_s14, %s15_s14   ;;  %s2972_s13 = sphi %s3010_s13, %s5432_s13   ;;  %s2968_s12 = sphi %s3008_s12, %s5431_s12   ;;  %s2964_s11 = sphi %s3006_s11, %s5430_s11   ;;  %s2960_s10 = sphi %s3004_s10, %s5429_s10   ;;  %s2956_s9 = sphi %s3002_s9, %s5428_s9  }
   0x5   : > { %s27_s17 = sadd.s32 1, %s2972_s13  ;;  %s86_s18 = sadd.s32 1, %s2964_s11 }
   0x6   : > { %p29_p0 = scmp.ge.s32.totalorder %s27_s17, 2  ;;  %p96_p1 = scmp.ne.s32.totalorder %s2964_s11, %s2960_s10 }
   0x7   : > { %p97_p2 = scmp.eq.s32.totalorder %s2333_s15, 1  ;;  %p102_p3 = scmp.ne.s32.totalorder %s2960_s10, %s2956_s9 }
   0x8   : > { %s5434_s17 = smov (%p29_p0, %s27_s17), 0  ;;  %p103_p5 = scmp.eq.s32.totalorder %s2334_s16, 1 }
   0x9   : > { %p3042_p4 = por %p97_p2, %p96_p1  ;;  %s83_s20 = ssub.s32 %s2972_s13, %s5434_s17 }
   0xa   : > { %p2338_p6 = scmp.ge.s32.totalorder %s2976_s14, 1  ;;  %p84_p7 = scmp.eq.s32.totalorder %s83_s20, 0 }
   0xb   : > { %p3049_p8 = por %p103_p5, %p102_p3  ;;  %p137_p9 = scmp.lt.s32.totalorder %s2976_s14, 3 }
   0xc   : > { %s3055_s22 = scalar_select %p84_p7, %s2964_s11, %s86_s18  }
   0xd   : > { %p138_p10 = pnand %p2338_p6, %p137_p9 }
   0xf   : > { %141 = sbr.rel (%p138_p10) target bundleno = 692 (0x2b4), region = 28 }
  0x14   : > { %v3060_v0 = vld [vmem:[%s5080_s1 + $0x10] sm:$0xff]  ;;  %v3065_v1 = vld [vmem:[%s5080_s1] sm:$0xff]  ;;  %v2978_v2 = vmov 4   ;;  %v3072_v3 = vld [vmem:[%s5080_s1 + $0x18] sm:$0xff]  ;;  %v2979_v33 = vmov 5   ;;  %v5087_v36 = vmov 0.0  }
  0x15   : > { %2549 = vset.pattern.permute.xlu1 %v2978_v2  ;;  %2548 = vset.pattern.permute.xlu0 %v2978_v2  ;;  %v3077_v4 = vld [vmem:[%s5080_s1 + $0x8] sm:$0xff]  ;;  %v3089_v6 = vld [vmem:[%s5080_s1 + $0x20] sm:$0xff]  ;;  %v3096_v7 = vld [vmem:[%s5080_s1 + $0x38] sm:$0xff]  ;;  %vm671_vm0 = vcmp.gt.f32.partialorder %v3060_v0, 0.0  ;;  %vm672_vm1 = vcmp.gt.f32.partialorder %v3072_v3, 0.0  ;;  %vm669_vm2 = vcmp.gt.f32.partialorder %v3065_v1, 0.0 }
  0x16   : > { %225 = vperm.xlu1 %2549, %v3060_v0   ;;  %215 = vperm.xlu0 %2548, %v3065_v1   ;;  %v3084_v5 = vld [vmem:[%s5080_s1 + $0x28] sm:$0xff]  ;;  %v3101_v8 = vld [vmem:[%s5080_s1 + $0x30] sm:$0xff]  ;;  %v3113_v10 = vld [vmem:[%s5080_s1 + $0x40] sm:$0xff]  ;;  %vm670_vm3 = vcmp.gt.f32.partialorder %v3077_v4, 0.0  ;;  %v2345_v37 = vsel %vm671_vm0, 1.0, %v5087_v36  ;;  %v2346_v38 = vsel %vm672_vm1, 1.0, %v5087_v36 }
  0x17   : > { %v3108_v9 = vld [vmem:[%s5080_s1 + $0x48] sm:$0xff]  ;;  %v3120_v11 = vld [vmem:[%s5080_s1 + $0x58] sm:$0xff]  ;;  %v3125_v12 = vld [vmem:[%s5080_s1 + $0x50] sm:$0xff]  ;;  %v2343_v39 = vsel %vm669_vm2, 1.0, %v5087_v36  ;;  %v2344_v40 = vsel %vm670_vm3, 1.0, %v5087_v36  ;;  %vm677_vm4 = vcmp.gt.f32.partialorder %v3113_v10, 0.0  ;;  %v3297_v41 = vpack.i.bf16 %v2346_v38, %v2345_v37 }
  0x18   : > { %v3132_v13 = vld [vmem:[%s5080_s1 + $0x68] sm:$0xff]  ;;  %v3137_v14 = vld [vmem:[%s5080_s1 + $0x60] sm:$0xff]  ;;  %v3144_v15 = vld [vmem:[%s5080_s1 + $0x78] sm:$0xff]  ;;  %vm678_vm5 = vcmp.gt.f32.partialorder %v3108_v9, 0.0  ;;  %vm673_vm6 = vcmp.gt.f32.partialorder %v3089_v6, 0.0  ;;  %vm674_vm7 = vcmp.gt.f32.partialorder %v3084_v5, 0.0  ;;  %v3299_v42 = vpack.i.bf16 %v2344_v40, %v2343_v39 }
  0x19   : > { %v3149_v16 = vld [vmem:[%s5080_s1 + $0x70] sm:$0xff]  ;;  %v3156_v17 = vld [vmem:[%s5080_s1 + $0x88] sm:$0xff]  ;;  %v3161_v18 = vld [vmem:[%s5080_s1 + $0x80] sm:$0xff]  ;;  %v2351_v45 = vsel %vm677_vm4, 1.0, %v5087_v36  ;;  %v2352_v46 = vsel %vm678_vm5, 1.0, %v5087_v36  ;;  %v2347_v47 = vsel %vm673_vm6, 1.0, %v5087_v36 }
  0x1a   : > { %230 = vperm.xlu1 %2549, %v3072_v3   ;;  %220 = vperm.xlu0 %2548, %v3077_v4   ;;  %v3168_v19 = vld [vmem:[%s5080_s1 + $0x98] sm:$0xff]  ;;  %v3173_v20 = vld [vmem:[%s5080_s1 + $0x90] sm:$0xff]  ;;  %v3180_v21 = vld [vmem:[%s5080_s1 + $0xa8] sm:$0xff]  ;;  %v2348_v48 = vsel %vm674_vm7, 1.0, %v5087_v36  ;;  %vm681_vm8 = vcmp.gt.f32.partialorder %v3137_v14, 0.0  ;;  %vm682_vm9 = vcmp.gt.f32.partialorder %v3132_v13, 0.0  ;;  %v2574_v50 = vpack.i.bf16 %v2352_v46, %v2351_v45 }
  0x1b   : > { %v3185_v22 = vld [vmem:[%s5080_s1 + $0xa0] sm:$0xff]  ;;  %v3192_v23 = vld [vmem:[%s5080_s1 + $0xb8] sm:$0xff]  ;;  %v3197_v24 = vld [vmem:[%s5080_s1 + $0xb0] sm:$0xff]  ;;  %vm675_vm10 = vcmp.gt.f32.partialorder %v3101_v8, 0.0  ;;  %vm676_vm11 = vcmp.gt.f32.partialorder %v3096_v7, 0.0  ;;  %v2981_v49 = vmov 0   ;;  %v3315_v51 = vpack.i.bf16 %v2348_v48, %v2347_v47 }
  0x1c   : > { %v3204_v25 = vld [vmem:[%s5080_s1 + $0xc8] sm:$0xff]  ;;  %v3209_v26 = vld [vmem:[%s5080_s1 + $0xc0] sm:$0xff]  ;;  %v3216_v27 = vld [vmem:[%s5080_s1 + $0xd8] sm:$0xff]  ;;  %v2355_v54 = vsel %vm681_vm8, 1.0, %v5087_v36  ;;  %v2356_v55 = vsel %vm682_vm9, 1.0, %v5087_v36  ;;  %v2349_v56 = vsel %vm675_vm10, 1.0, %v5087_v36 }
  0x1d   : > { %v3221_v28 = vld [vmem:[%s5080_s1 + $0xd0] sm:$0xff]  ;;  %v3228_v29 = vld [vmem:[%s5080_s1 + $0xe8] sm:$0xff]  ;;  %v3233_v30 = vld [vmem:[%s5080_s1 + $0xe0] sm:$0xff]  ;;  %v2350_v57 = vsel %vm676_vm11, 1.0, %v5087_v36  ;;  %vm685_vm12 = vcmp.gt.f32.partialorder %v3161_v18, 0.0  ;;  %vm686_vm13 = vcmp.gt.f32.partialorder %v3156_v17, 0.0  ;;  %v3330_v58 = vpack.i.bf16 %v2356_v55, %v2355_v54 }
  0x1e   : > { %240 = vperm.xlu1 %2549, %v3084_v5   ;;  %235 = vperm.xlu0 %2548, %v3089_v6   ;;  %v3240_v31 = vld [vmem:[%s5080_s1 + $0xf8] sm:$0xff]  ;;  %v3245_v32 = vld [vmem:[%s5080_s1 + $0xf0] sm:$0xff]  ;;  %vm679_vm14 = vcmp.gt.f32.partialorder %v3125_v12, 0.0  ;;  %vm680_vm15 = vcmp.gt.f32.partialorder %v3120_v11, 0.0  ;;  %v3332_v59 = vpack.i.bf16 %v2350_v57, %v2349_v56  ;;  %v2359_v62 = vsel %vm685_vm12, 1.0, %v5087_v36  ;;  %p163_p11 = scmp.lt.s32.totalorder %s2968_s12, 1 }
  0x1f   : > { %v2360_v63 = vsel %vm686_vm13, 1.0, %v5087_v36  ;;  %v2353_v2 = vsel %vm679_vm14, 1.0, %v5087_v36  ;;  %vm689_vm0 = vcmp.gt.f32.partialorder %v3185_v22, 0.0  ;;  %vm690_vm1 = vcmp.gt.f32.partialorder %v3180_v21, 0.0  ;;  %s160_s26 = sand.u32 1, %s2960_s10   ;;  %s2478_s28 = sshll.u32 %s2968_s12, 7 }
  0x20   : > { %vm683_vm2 = vcmp.gt.f32.partialorder %v3149_v16, 0.0  ;;  %vm684_vm3 = vcmp.gt.f32.partialorder %v3144_v15, 0.0  ;;  %v2594_v37 = vpack.i.bf16 %v2360_v63, %v2359_v62  ;;  %v2363_v45 = vsel %vm689_vm0, 1.0, %v5087_v36  ;;  %s164_s5 = scalar_select %p163_p11, %s2968_s12, 1 }
  0x21   : > { %v2364_v46 = vsel %vm690_vm1, 1.0, %v5087_v36  ;;  %v2357_v47 = vsel %vm683_vm2, 1.0, %v5087_v36  ;;  %v2358_v48 = vsel %vm684_vm3, 1.0, %v5087_v36  ;;  %vm693_vm4 = vcmp.gt.f32.partialorder %v3209_v26, 0.0  ;;  %s2339_s27 = sshll.u32 %s160_s26, 3  ;;  %s2238_s15 = scalar_lea.sflag [#allocation5], %s160_s26 }
  0x22   : > { %250 = vperm.xlu1 %2549, %v3096_v7   ;;  %245 = vperm.xlu0 %2548, %v3101_v8   ;;  %vm694_vm5 = vcmp.gt.f32.partialorder %v3204_v25, 0.0  ;;  %vm687_vm6 = vcmp.gt.f32.partialorder %v3173_v20, 0.0  ;;  %vm688_vm7 = vcmp.gt.f32.partialorder %v3168_v19, 0.0  ;;  %v2367_v56 = vsel %vm693_vm4, 1.0, %v5087_v36  ;;  %s2340_s8 = sshll.u32 %s164_s5, 3  ;;  %s162_s30 = scalar_lea.vmem [#allocation4], %s2339_s27 }
  0x23   : > { %v2368_v57 = vsel %vm694_vm5, 1.0, %v5087_v36  ;;  %v2361_v62 = vsel %vm687_vm6, 1.0, %v5087_v36  ;;  %v2362_v63 = vsel %vm688_vm7, 1.0, %v5087_v36  ;;  %vm697_vm8 = vcmp.gt.f32.partialorder %v3233_v30, 0.0  ;;  %s3572_s3 = scalar_lea.vmem %s5079_s0, %s2340_s8  ;;  %s5039_s8 = scalar_lea.hbm %s5081_s2, %s2478_s28 }
  0x24   : > { %vm698_vm9 = vcmp.gt.f32.partialorder %v3228_v29, 0.0  ;;  %vm691_vm10 = vcmp.gt.f32.partialorder %v3197_v24, 0.0  ;;  %vm692_vm11 = vcmp.gt.f32.partialorder %v3192_v23, 0.0  ;;  %vm695_vm12 = vcmp.gt.f32.partialorder %v3221_v28, 0.0  ;;  %s2986_s12 = smov [#allocation4]  }
  0x25   : > { %vm696_vm13 = vcmp.gt.f32.partialorder %v3216_v27, 0.0  ;;  %vm765_vm14 = vcmp.gt.f32.partialorder %v3065_v1, 0.5  ;;  %vm699_vm0 = vcmp.gt.f32.partialorder %v3245_v32, 0.0  ;;  %vm700_vm1 = vcmp.gt.f32.partialorder %v3240_v31, 0.0  ;;  %s2904_s18 = sshll.u32 %s2986_s12, 4  ;;  %s2905_s18 = int_to_ptr.vmem [resolvable:$false] %s2904_s18 }
  0x26   : > { %260 = vperm.xlu1 %2549, %v3108_v9   ;;  %255 = vperm.xlu0 %2548, %v3113_v10   ;;  %vm771_vm2 = vcmp.gt.f32.partialorder %v3101_v8, 0.5  ;;  %vm772_vm3 = vcmp.gt.f32.partialorder %v3096_v7, 0.5  ;;  %vm775_vm4 = vcmp.gt.f32.partialorder %v3125_v12, 0.5  ;;  %vm776_vm5 = vcmp.gt.f32.partialorder %v3120_v11, 0.5  ;;  %s2906_s20 = scalar_lea.vmem %s2905_s18, 256 }
  0x27   : > { %vm767_vm6 = vcmp.gt.f32.partialorder %v3060_v0, 0.5  ;;  %vm768_vm7 = vcmp.gt.f32.partialorder %v3072_v3, 0.5 }
  0x2a   : > { %270 = vperm.xlu1 %2549, %v3120_v11   ;;  %265 = vperm.xlu0 %2548, %v3125_v12  }
  0x2e   : > { %280 = vperm.xlu1 %2549, %v3132_v13   ;;  %275 = vperm.xlu0 %2548, %v3137_v14  }
  0x32   : > { %290 = vperm.xlu1 %2549, %v3144_v15   ;;  %285 = vperm.xlu0 %2548, %v3149_v16  }
  0x36   : > { %300 = vperm.xlu1 %2549, %v3156_v17   ;;  %295 = vperm.xlu0 %2548, %v3161_v18  }
  0x3a   : > { %310 = vperm.xlu1 %2549, %v3168_v19   ;;  %305 = vperm.xlu0 %2548, %v3173_v20  }
  0x3e   : > { %320 = vperm.xlu1 %2549, %v3180_v21   ;;  %315 = vperm.xlu0 %2548, %v3185_v22  }
  0x42   : > { %330 = vperm.xlu1 %2549, %v3192_v23   ;;  %325 = vperm.xlu0 %2548, %v3197_v24  }
  0x46   : > { %340 = vperm.xlu1 %2549, %v3204_v25   ;;  %335 = vperm.xlu0 %2548, %v3209_v26  }
  0x4a   : > { %350 = vperm.xlu1 %2549, %v3216_v27   ;;  %345 = vperm.xlu0 %2548, %v3221_v28  }
  0x4e   : > { %360 = vperm.xlu1 %2549, %v3228_v29   ;;  %355 = vperm.xlu0 %2548, %v3233_v30  }
  0x52   : > { %370 = vperm.xlu1 %2549, %v3240_v31   ;;  %365 = vperm.xlu0 %2548, %v3245_v32  }
  0x56   : > { %2551 = vset.pattern.permute.xlu1 %v2979_v33  ;;  %2550 = vset.pattern.permute.xlu0 %v2979_v33  ;;  %v2354_v33 = vsel %vm680_vm15, 1.0, %v5087_v36  ;;  %vm766_vm15 = vcmp.gt.f32.partialorder %v3077_v4, 0.5 }
  0x57   : > { %414 = vperm.xlu1 %2551, %v3077_v4   ;;  %410 = vperm.xlu0 %2550, %v3065_v1   ;;  %v3348_v38 = vpack.i.bf16 %v2354_v33, %v2353_v2  ;;  %v2614_v2 = vpack.i.bf16 %v2368_v57, %v2367_v56  ;;  %v3378_v33 = vpack.i.bf16 %v2362_v63, %v2361_v62  ;;  %v2369_v63 = vsel %vm695_vm12, 1.0, %v5087_v36 }
  0x58   : > { %v2376_v1 = vsel %vm766_vm15, 1.0, %v5087_v36  ;;  %vm783_vm12 = vcmp.gt.f32.partialorder %v3173_v20, 0.5  ;;  %vm774_vm15 = vcmp.gt.f32.partialorder %v3108_v9, 0.5 }
  0x5b   : > { %418 = vperm.xlu1 %2551, %v3060_v0   ;;  %422 = vperm.xlu0 %2550, %v3072_v3   ;;  %v2377_v0 = vsel %vm767_vm6, 1.0, %v5087_v36  ;;  %v2378_v3 = vsel %vm768_vm7, 1.0, %v5087_v36  ;;  %vm781_vm6 = vcmp.gt.f32.partialorder %v3161_v18, 0.5  ;;  %vm782_vm7 = vcmp.gt.f32.partialorder %v3156_v17, 0.5 }
  0x5f   : > { %426 = vperm.xlu1 %2551, %v3089_v6   ;;  %430 = vperm.xlu0 %2550, %v3084_v5  }
  0x63   : > { %434 = vperm.xlu1 %2551, %v3101_v8   ;;  %438 = vperm.xlu0 %2550, %v3096_v7   ;;  %v2382_v8 = vsel %vm772_vm3, 1.0, %v5087_v36  ;;  %v2982_v7 = vmov 2   ;;  %vm778_vm3 = vcmp.gt.f32.partialorder %v3132_v13, 0.5 }
  0x67   : > { %442 = vperm.xlu1 %2551, %v3113_v10   ;;  %446 = vperm.xlu0 %2550, %v3108_v9   ;;  %v2384_v9 = vsel %vm774_vm15, 1.0, %v5087_v36  ;;  %vm794_vm15 = vcmp.gt.f32.partialorder %v3228_v29, 0.5 }
  0x6b   : > { %450 = vperm.xlu1 %2551, %v3125_v12   ;;  %454 = vperm.xlu0 %2550, %v3120_v11   ;;  %v2385_v12 = vsel %vm775_vm4, 1.0, %v5087_v36  ;;  %v2386_v11 = vsel %vm776_vm5, 1.0, %v5087_v36  ;;  %vm791_vm4 = vcmp.gt.f32.partialorder %v3221_v28, 0.5  ;;  %vm792_vm5 = vcmp.gt.f32.partialorder %v3216_v27, 0.5 }
  0x6f   : > { %458 = vperm.xlu1 %2551, %v3137_v14   ;;  %462 = vperm.xlu0 %2550, %v3132_v13  }
  0x73   : > { %466 = vperm.xlu1 %2551, %v3149_v16   ;;  %470 = vperm.xlu0 %2550, %v3144_v15  }
  0x77   : > { %474 = vperm.xlu1 %2551, %v3161_v18   ;;  %478 = vperm.xlu0 %2550, %v3156_v17   ;;  %v2392_v18 = vsel %vm782_vm7, 1.0, %v5087_v36 }
  0x7b   : > { %482 = vperm.xlu1 %2551, %v3173_v20   ;;  %486 = vperm.xlu0 %2550, %v3168_v19   ;;  %v2393_v20 = vsel %vm783_vm12, 1.0, %v5087_v36  ;;  %vm789_vm12 = vcmp.gt.f32.partialorder %v3209_v26, 0.5 }
  0x7f   : > { %490 = vperm.xlu1 %2551, %v3185_v22   ;;  %494 = vperm.xlu0 %2550, %v3180_v21  }
  0x83   : > { %498 = vperm.xlu1 %2551, %v3197_v24   ;;  %502 = vperm.xlu0 %2550, %v3192_v23  }
  0x87   : > { %506 = vperm.xlu1 %2551, %v3209_v26   ;;  %510 = vperm.xlu0 %2550, %v3204_v25  }
  0x8b   : > { %514 = vperm.xlu1 %2551, %v3221_v28   ;;  %518 = vperm.xlu0 %2550, %v3216_v27   ;;  %v2402_v28 = vsel %vm792_vm5, 1.0, %v5087_v36  ;;  %v2391_v27 = vsel %vm781_vm6, 1.0, %v5087_v36 }
  0x8f   : > { %522 = vperm.xlu1 %2551, %v3233_v30   ;;  %526 = vperm.xlu0 %2550, %v3228_v29  }
  0x91   : > { %v3283_v34 = vpop.permute.xlu1 %225  ;;  %v3285_v35 = vpop.permute.xlu0 %215 }
  0x93   : > { %530 = vperm.xlu1 %2551, %v3245_v32   ;;  %534 = vperm.xlu0 %2550, %v3240_v31  }
  0x95   : > { %v3301_v43 = vpop.permute.xlu1 %230  ;;  %v3303_v44 = vpop.permute.xlu0 %220 }
  0x97   : > { %2552 = vset.pattern.permute.xlu1 %v2981_v49  ;;  %2558 = vset.pattern.permute.xlu0 %v2981_v49  ;;  %v3363_v49 = vpack.i.bf16 %v2364_v46, %v2363_v45  ;;  %v2371_v46 = vsel %vm697_vm8, 1.0, %v5087_v36  ;;  %vm779_vm8 = vcmp.gt.f32.partialorder %v3149_v16, 0.5 }
  0x98   : > { %2560 = vperm.xlu0 %2558, %v3297_v41   ;;  %2554 = vperm.xlu1 %2552, %v3299_v42  }
  0x99   : > { %v3317_v52 = vpop.permute.xlu1 %240  ;;  %v3319_v53 = vpop.permute.xlu0 %235 }
  0x9c   : > { %2575 = vperm.xlu0 %2558, %v2574_v50   ;;  %2565 = vperm.xlu1 %2552, %v3315_v51   ;;  %v2589_v50 = vpack.i.bf16 %v2358_v48, %v2357_v47  ;;  %v2372_v47 = vsel %vm698_vm9, 1.0, %v5087_v36  ;;  %v2365_v48 = vsel %vm691_vm10, 1.0, %v5087_v36  ;;  %vm780_vm9 = vcmp.gt.f32.partialorder %v3144_v15, 0.5 }
  0x9d   : > { %v3334_v60 = vpop.permute.xlu1 %250  ;;  %v3336_v61 = vpop.permute.xlu0 %245  ;;  %vm769_vm10 = vcmp.gt.f32.partialorder %v3089_v6, 0.5  ;;  %v2389_v15 = vsel %vm779_vm8, 1.0, %v5087_v36  ;;  %v2390_v6 = vsel %vm780_vm9, 1.0, %v5087_v36  ;;  %vm795_vm8 = vcmp.gt.f32.partialorder %v3245_v32, 0.5 }
  0x9e   : > { %vm796_vm9 = vcmp.gt.f32.partialorder %v3240_v31, 0.5 }
  0x9f   : > { %v2406_v32 = vsel %vm796_vm9, 1.0, %v5087_v36 }
  0xa0   : > { %2585 = vperm.xlu0 %2558, %v3330_v58   ;;  %2570 = vperm.xlu1 %2552, %v3332_v59  }
  0xa1   : > { %v3350_v39 = vpop.permute.xlu1 %260  ;;  %v3352_v40 = vpop.permute.xlu0 %255 }
  0xa4   : > { %2595 = vperm.xlu0 %2558, %v2594_v37   ;;  %2580 = vperm.xlu1 %2552, %v3348_v38  }
  0xa5   : > { %v3365_v54 = vpop.permute.xlu1 %270  ;;  %v3367_v55 = vpop.permute.xlu0 %265 }
  0xa6   : > { %5115 = vst [vmem:[#allocation7_spill] sm:$0xff] %v3367_v55  ;;  %v2366_v55 = vsel %vm692_vm11, 1.0, %v5087_v36  ;;  %vm770_vm11 = vcmp.gt.f32.partialorder %v3084_v5, 0.5  ;;  %v2379_v5 = vsel %vm769_vm10, 1.0, %v5087_v36  ;;  %vm785_vm10 = vcmp.gt.f32.partialorder %v3185_v22, 0.5 }
  0xa7   : > { %v2609_v56 = vpack.i.bf16 %v2366_v55, %v2365_v48  ;;  %v2374_v48 = vsel %vm700_vm1, 1.0, %v5087_v36  ;;  %v2380_v16 = vsel %vm770_vm11, 1.0, %v5087_v36  ;;  %vm788_vm1 = vcmp.gt.f32.partialorder %v3192_v23, 0.5 }
  0xa8   : > { %2605 = vperm.xlu0 %2558, %v3363_v49   ;;  %2590 = vperm.xlu1 %2552, %v2589_v50   ;;  %v3393_v50 = vpack.i.bf16 %v2372_v47, %v2371_v46  ;;  %v2373_v47 = vsel %vm699_vm0, 1.0, %v5087_v36  ;;  %vm787_vm0 = vcmp.gt.f32.partialorder %v3197_v24, 0.5  ;;  %v2398_v24 = vsel %vm788_vm1, 1.0, %v5087_v36 }
  0xa9   : > { %v3380_v37 = vpop.permute.xlu1 %280  ;;  %v3382_v45 = vpop.permute.xlu0 %275  ;;  %vm786_vm11 = vcmp.gt.f32.partialorder %v3180_v21, 0.5  ;;  %v2395_v31 = vsel %vm785_vm10, 1.0, %v5087_v36 }
  0xaa   : > { %5116 = vst [vmem:[#allocation8_spill] sm:$0xff] %v3380_v37  ;;  %5117 = vst [vmem:[#allocation9_spill] sm:$0xff] %v3382_v45  ;;  %v2370_v45 = vsel %vm696_vm13, 1.0, %v5087_v36  ;;  %v2375_v37 = vsel %vm765_vm14, 1.0, %v5087_v36  ;;  %vm784_vm13 = vcmp.gt.f32.partialorder %v3168_v19, 0.5  ;;  %vm773_vm14 = vcmp.gt.f32.partialorder %v3113_v10, 0.5 }
  0xab   : > { %v3408_v4 = vpack.i.bf16 %v2370_v45, %v2369_v63  ;;  %v3414_v46 = vpack.i.bf16 %v2376_v1, %v2375_v37  ;;  %v2629_v37 = vpack.i.bf16 %v2374_v48, %v2373_v47  ;;  %v2983_v1 = vmov 1e+09  }
  0xac   : > { %2615 = vperm.xlu0 %2558, %v2614_v2   ;;  %2600 = vperm.xlu1 %2552, %v3378_v33   ;;  %177 = vst [vmem:[#allocation2] sm:$0x3] %v2983_v1  ;;  %178 = vst [vmem:[#allocation3] sm:$0x3] %v2983_v1  ;;  %v3445_v48 = vpack.i.bf16 %v2386_v11, %v2385_v12  ;;  %v2671_v11 = vpack.i.bf16 %v2390_v6, %v2389_v15  ;;  %v2394_v19 = vsel %vm784_vm13, 1.0, %v5087_v36 }
  0xad   : > { %v3395_v57 = vpop.permute.xlu1 %290  ;;  %v3397_v62 = vpop.permute.xlu0 %285  ;;  %v2383_v10 = vsel %vm773_vm14, 1.0, %v5087_v36  ;;  %v3478_v1 = vpack.i.bf16 %v2394_v19, %v2393_v20  ;;  %v2397_v6 = vsel %vm787_vm0, 1.0, %v5087_v36  ;;  %v2401_v20 = vsel %vm791_vm4, 1.0, %v5087_v36 }
  0xae   : > { %5118 = vst [vmem:[#allocation10_spill] sm:$0xff] %v3397_v62  ;;  %v2381_v62 = vsel %vm771_vm2, 1.0, %v5087_v36  ;;  %vm777_vm2 = vcmp.gt.f32.partialorder %v3137_v14, 0.5  ;;  %v2656_v15 = vpack.i.bf16 %v2384_v9, %v2383_v10  ;;  %v2388_v14 = vsel %vm778_vm3, 1.0, %v5087_v36 }
  0xaf   : > { %v3430_v63 = vpack.i.bf16 %v2382_v8, %v2381_v62  ;;  %v3447_v8 = vpack.i.bf16 %v2378_v3, %v2377_v0  ;;  %v3463_v0 = vpack.i.bf16 %v2380_v16, %v2379_v5  ;;  %5119 = vst [vmem:[#allocation11_spill] sm:$0xff] %v3478_v1  ;;  %v2387_v23 = vsel %vm777_vm2, 1.0, %v5087_v36 }
  0xb0   : > { %2625 = vperm.xlu0 %2558, %v3393_v50   ;;  %2610 = vperm.xlu1 %2552, %v2609_v56   ;;  %v2691_v16 = vpack.i.bf16 %v2398_v24, %v2397_v6  ;;  %v3508_v10 = vpack.i.bf16 %v2402_v28, %v2401_v20  ;;  %v2676_v9 = vpack.i.bf16 %v2392_v18, %v2391_v27  ;;  %v2396_v22 = vsel %vm786_vm11, 1.0, %v5087_v36 }
  0xb1   : > { %v3410_v55 = vpop.permute.xlu1 %300  ;;  %v3412_v2 = vpop.permute.xlu0 %295  ;;  %vm790_vm13 = vcmp.gt.f32.partialorder %v3204_v25, 0.5  ;;  %vm793_vm14 = vcmp.gt.f32.partialorder %v3233_v30, 0.5  ;;  %v2404_v27 = vsel %vm794_vm15, 1.0, %v5087_v36  ;;  %v5082_v18 = vmov 1  }
  0xb2   : > { %5120 = vst [vmem:[#allocation12_spill] sm:$0xff] %v3508_v10  ;;  %v2403_v28 = vsel %vm793_vm14, 1.0, %v5087_v36 }
  0xb3   : > { %v3536_v30 = vpack.i.bf16 %v2404_v27, %v2403_v28  ;;  %v1029_v28 = vlaneseq }
  0xb4   : > { %2634 = vset.pattern.permute.xlu0 %v2982_v7  ;;  %2620 = vperm.xlu1 %2552, %v3408_v4  }
  0xb5   : > { %v3425_v45 = vpop.permute.xlu1 %310  ;;  %v3427_v56 = vpop.permute.xlu0 %305  ;;  %2636 = vperm.xlu0 %2634, %v3414_v46   ;;  %5121 = vst [vmem:[#allocation13_spill] sm:$0xff] %v3536_v30 }
  0xb8   : > { %2630 = vperm.xlu1 %2552, %v2629_v37  }
  0xb9   : > { %v3440_v62 = vpop.permute.xlu1 %320  ;;  %v3442_v47 = vpop.permute.xlu0 %315  ;;  %2652 = vperm.xlu0 %2634, %v3430_v63  }
  0xbc   : > { %2640 = vset.pattern.permute.xlu1 %v2982_v7 }
  0xbd   : > { %v3457_v37 = vpop.permute.xlu1 %330  ;;  %v3459_v12 = vpop.permute.xlu0 %325  ;;  %2662 = vperm.xlu0 %2634, %v3445_v48   ;;  %2642 = vperm.xlu1 %2640, %v3447_v8  }
  0xc1   : > { %v3473_v7 = vpop.permute.xlu1 %340  ;;  %v3475_v3 = vpop.permute.xlu0 %335  ;;  %2672 = vperm.xlu0 %2634, %v2671_v11   ;;  %2647 = vperm.xlu1 %2640, %v3463_v0   ;;  %v3493_v11 = vpack.i.bf16 %v2388_v14, %v2387_v23  ;;  %v3521_v23 = vpack.i.bf16 %v2396_v22, %v2395_v31  ;;  %v2399_v14 = vsel %vm789_vm12, 1.0, %v5087_v36  ;;  %v1413_v31 = vld [vmem:[%s5080_s1 + $0x40] sm:$0xff]  ;;  %v1414_v22 = vld [vmem:[%s5080_s1 + $0x48] sm:$0xff] }
  0xc2   : > { %vm1445_vm0 = vcmp.gt.f32.partialorder %v1413_v31, 0.0  ;;  %vm1446_vm1 = vcmp.gt.f32.partialorder %v1414_v22, 0.0  ;;  %vm1541_vm2 = vcmp.gt.f32.partialorder %v1413_v31, 0.5  ;;  %vm1542_vm3 = vcmp.gt.f32.partialorder %v1414_v22, 0.5 }
  0xc3   : > { %v3581_v27 = vsel %vm1445_vm0, 1.0, %v5087_v36  ;;  %v3593_v31 = vsel %vm1542_vm3, 1.0, %v5087_v36 }
  0xc5   : > { %v3488_v13 = vpop.permute.xlu1 %350  ;;  %v3490_v5 = vpop.permute.xlu0 %345  ;;  %2682 = vperm.xlu0 %2634, %v3478_v1   ;;  %2657 = vperm.xlu1 %2640, %v2656_v15   ;;  %v2405_v15 = vsel %vm795_vm8, 1.0, %v5087_v36 }
  0xc6   : > { %v2711_v24 = vpack.i.bf16 %v2406_v32, %v2405_v15 }
  0xc9   : > { %v3503_v17 = vpop.permute.xlu1 %360  ;;  %v3505_v19 = vpop.permute.xlu0 %355  ;;  %2692 = vperm.xlu0 %2634, %v2691_v16   ;;  %2667 = vperm.xlu1 %2640, %v3493_v11   ;;  %v2400_v16 = vsel %vm790_vm13, 1.0, %v5087_v36 }
  0xca   : > { %v2696_v25 = vpack.i.bf16 %v2400_v16, %v2399_v14  ;;  %v1422_v14 = vld [vmem:[%s5080_s1 + $0x88] sm:$0xff] }
  0xcb   : > { %vm1454_vm9 = vcmp.gt.f32.partialorder %v1422_v14, 0.0  ;;  %vm1550_vm11 = vcmp.gt.f32.partialorder %v1422_v14, 0.5  ;;  %v1428_v14 = vld [vmem:[%s5080_s1 + $0xb8] sm:$0xff] }
  0xcc   : > { %vm1460_vm14 = vcmp.gt.f32.partialorder %v1428_v14, 0.0  ;;  %vm1556_vm0 = vcmp.gt.f32.partialorder %v1428_v14, 0.5 }
  0xcd   : > { %v3516_v21 = vpop.permute.xlu1 %370  ;;  %v3518_v6 = vpop.permute.xlu0 %365  ;;  %2702 = vperm.xlu0 %2634, %v3508_v10   ;;  %2677 = vperm.xlu1 %2640, %v2676_v9  }
  0xd1   : > { %2712 = vperm.xlu0 %2634, %v2711_v24   ;;  %2687 = vperm.xlu1 %2640, %v3521_v23   ;;  %v1420_v24 = vld [vmem:[%s5080_s1 + $0x78] sm:$0xff] }
  0xd2   : > { %v3528_v26 = vpop.permute.xlu1 %414  ;;  %v3530_v20 = vpop.permute.xlu0 %410  ;;  %vm1452_vm5 = vcmp.gt.f32.partialorder %v1420_v24, 0.0  ;;  %vm1548_vm7 = vcmp.gt.f32.partialorder %v1420_v24, 0.5 }
  0xd5   : > { %2722 = vset.pattern.permute.xlu0 %v5082_v18  ;;  %2697 = vperm.xlu1 %2640, %v2696_v25  }
  0xd6   : > { %v3538_v29 = vpop.permute.xlu1 %418  ;;  %v3540_v9 = vpop.permute.xlu0 %422  ;;  %2724 = vperm.xlu0 %2722, %v3297_v41   ;;  %v1419_v41 = vld [vmem:[%s5080_s1 + $0x70] sm:$0xff] }
  0xd7   : > { %5122 = vst [vmem:[#allocation14_spill] sm:$0xff] %v3538_v29  ;;  %5123 = vst [vmem:[#allocation15_spill] sm:$0xff] %v3540_v9  ;;  %vm1451_vm4 = vcmp.gt.f32.partialorder %v1419_v41, 0.0  ;;  %vm1547_vm6 = vcmp.gt.f32.partialorder %v1419_v41, 0.5 }
  0xd8   : > { %v3603_v1 = vsel %vm1451_vm4, 1.0, %v5087_v36 }
  0xd9   : > { %2707 = vperm.xlu1 %2640, %v3536_v30   ;;  %v3607_v30 = vsel %vm1452_vm5, 1.0, %v5087_v36 }
  0xda   : > { %v3545_v15 = vpop.permute.xlu1 %426  ;;  %v3547_v32 = vpop.permute.xlu0 %430  ;;  %2756 = vperm.xlu0 %2722, %v3348_v38   ;;  %v1421_v38 = vld [vmem:[%s5080_s1 + $0x80] sm:$0xff] }
  0xdb   : > { %5124 = vst [vmem:[#allocation16_spill] sm:$0xff] %v3545_v15  ;;  %5125 = vst [vmem:[#allocation17_spill] sm:$0xff] %v3547_v32  ;;  %vm1453_vm8 = vcmp.gt.f32.partialorder %v1421_v38, 0.0  ;;  %vm1549_vm10 = vcmp.gt.f32.partialorder %v1421_v38, 0.5  ;;  %v1427_v15 = vld [vmem:[%s5080_s1 + $0xb0] sm:$0xff]  ;;  %v3645_v32 = vsel %vm1550_vm11, 1.0, %v5087_v36 }
  0xdc   : > { %v3632_v24 = vsel %vm1549_vm10, 1.0, %v5087_v36  ;;  %5134 = vst [vmem:[#allocation26_spill] sm:$0xff] %v3645_v32  ;;  %vm1459_vm13 = vcmp.gt.f32.partialorder %v1427_v15, 0.0  ;;  %vm1555_vm15 = vcmp.gt.f32.partialorder %v1427_v15, 0.5 }
  0xdd   : > { %2716 = vset.pattern.permute.xlu1 %v5082_v18  ;;  %v3584_v18 = vld [vmem:[%s3572_s3 + $0x4] ss:$0 sm:$0xff]  ;;  %5133 = vst [vmem:[#allocation25_spill] sm:$0xff] %v3632_v24 }
  0xde   : > { %v3574_v16 = vpop.permute.xlu1 %434  ;;  %v3576_v25 = vpop.permute.xlu0 %438  ;;  %2772 = vperm.xlu0 %2722, %v3330_v58   ;;  %2718 = vperm.xlu1 %2716, %v3299_v42   ;;  %v3587_v58 = vsel %vm1446_vm1, 1.0, %v5087_v36  ;;  %v3590_v42 = vsel %vm1541_vm2, 1.0, %v5087_v36  ;;  %v377_v41 = vsub.f32 %v3285_v35, %v3584_v18  ;;  %v378_v35 = vsub.f32 %v3303_v44, %v3584_v18 }
  0xdf   : > { %5126 = vst [vmem:[#allocation18_spill] sm:$0xff] %v3574_v16  ;;  %5127 = vst [vmem:[#allocation19_spill] sm:$0xff] %v3576_v25  ;;  %v3611_v25 = vsel %vm1547_vm6, 1.0, %v5087_v36  ;;  %v1030_v16 = vshrl.u32 %v1029_v28, 7  ;;  %v379_v28 = vsub.f32 %v3283_v34, %v3584_v18  ;;  %v385_v15 = vsub.f32 %v3352_v40, %v3584_v18 }
  0xe0   : > { %5130 = vst [vmem:[#allocation22_spill] sm:$0xff] %v3611_v25  ;;  %v3668_v34 = vmul.f32 %v377_v41, %v377_v41  ;;  %v384_v41 = vsub.f32 %v3334_v60, %v3584_v18 }
  0xe1   : > { %v3666_v29 = vmul.f32 %v379_v28, %v379_v28  ;;  %v381_v28 = vsub.f32 %v3319_v53, %v3584_v18 }
  0xe2   : > { %v3595_v22 = vpop.permute.xlu1 %442  ;;  %v3597_v10 = vpop.permute.xlu0 %446  ;;  %2795 = vperm.xlu0 %2722, %v3378_v33   ;;  %2729 = vperm.xlu1 %2716, %v3315_v51   ;;  %v3620_v51 = vsel %vm1453_vm8, 1.0, %v5087_v36  ;;  %v3624_v33 = vsel %vm1454_vm9, 1.0, %v5087_v36 }
  0xe3   : > { %5128 = vst [vmem:[#allocation20_spill] sm:$0xff] %v3595_v22  ;;  %5129 = vst [vmem:[#allocation21_spill] sm:$0xff] %v3597_v10  ;;  %v861_v22 = vld [vmem:[%s3572_s3] sm:$0x1]  ;;  %v3616_v10 = vsel %vm1548_vm7, 1.0, %v5087_v36  ;;  %v3661_v36 = vsub.s32 0, %v1030_v16 }
  0xe4   : > { %5131 = vst [vmem:[#allocation23_spill] sm:$0xff] %v3620_v51  ;;  %5132 = vst [vmem:[#allocation24_spill] sm:$0xff] %v3624_v33  ;;  %vm862_vm12 = vcmp.gt.f32.partialorder %v861_v22, 0.0  ;;  %v380_v22 = vsub.f32 %v3301_v43, %v3584_v18  ;;  %v382_v43 = vsub.f32 %v3317_v52, %v3584_v18  ;;  %v1429_v16 = vld [vmem:[%s5080_s1 + $0xc0] sm:$0xff]  ;;  %v5092_v52 = vmov 3  }
  0xe5   : > { %5136 = vst [vmem:[#allocation28_spill] sm:$0xff] %v3661_v36  ;;  %v383_v33 = vsub.f32 %v3336_v61, %v3584_v18  ;;  %vm1461_vm1 = vcmp.gt.f32.partialorder %v1429_v16, 0.0  ;;  %v388_v61 = vsub.f32 %v3365_v54, %v3584_v18  ;;  %vm1557_vm3 = vcmp.gt.f32.partialorder %v1429_v16, 0.5 }
  0xe6   : > { %v3647_v38 = vpop.permute.xlu1 %450  ;;  %v3649_v9 = vpop.permute.xlu0 %454  ;;  %2811 = vperm.xlu0 %2722, %v3363_v49   ;;  %2734 = vperm.xlu1 %2716, %v3332_v59   ;;  %v5137_v59 = vmov 0.0   ;;  %v1430_v49 = vld [vmem:[%s5080_s1 + $0xc8] sm:$0xff]  ;;  %v3698_v53 = vmul.f32 %v380_v22, %v380_v22  ;;  %v386_v22 = vsub.f32 %v3350_v39, %v3584_v18 }
  0xe7   : > { %5135 = vst [vmem:[#allocation27_spill] sm:$0xff] %v3649_v9  ;;  %v2407_v9 = vsel %vm862_vm12, 1.0, %v5137_v59  ;;  %v3692_v32 = vsel %vm1459_vm13, 1.0, %v5137_v59  ;;  %v3696_v51 = vsel %vm1460_vm14, 1.0, %v5137_v59  ;;  %vm1462_vm2 = vcmp.gt.f32.partialorder %v1430_v49, 0.0 }
  0xe8   : > { %5138 = vst [vmem:[#allocation29_spill] sm:$0xff] %v3692_v32  ;;  %5139 = vst [vmem:[#allocation30_spill] sm:$0xff] %v3696_v51  ;;  %v3702_v60 = vrot.slane %v2407_v9, %v3661_v36  ;;  %v3718_v9 = vmul.f32 %v382_v43, %v382_v43  ;;  %v3739_v40 = vsel %vm1461_vm1, 1.0, %v5137_v59  ;;  %v3742_v43 = vsel %vm1462_vm2, 1.0, %v5137_v59 }
  0xe9   : > { %5140 = vst [vmem:[#allocation31_spill] sm:$0xff] %v3698_v53  ;;  %v3726_v53 = vmul.f32 %v384_v41, %v384_v41  ;;  %5144 = vst [vmem:[#allocation35_spill] sm:$0xff] %v3739_v40  ;;  %vm1558_vm4 = vcmp.gt.f32.partialorder %v1430_v49, 0.5  ;;  %v3744_v54 = vmul.f32 %v383_v33, %v383_v33  ;;  %v3748_v41 = vmul.f32 %v385_v15, %v385_v15  ;;  %v1435_v49 = vld [vmem:[%s5080_s1 + $0xf0] sm:$0xff]  ;;  %v1436_v33 = vld [vmem:[%s5080_s1 + $0xf8] sm:$0xff] }
  0xea   : > { %v3684_v24 = vpop.permute.xlu1 %458  ;;  %v3686_v44 = vpop.permute.xlu0 %462  ;;  %2834 = vperm.xlu0 %2722, %v3408_v4   ;;  %2738 = vset.pattern.permute.xlu1 %v5092_v52  ;;  %5141 = vst [vmem:[#allocation32_spill] sm:$0xff] %v3702_v60  ;;  %v3706_v4 = vsel %vm1555_vm15, 1.0, %v5137_v59  ;;  %v3710_v52 = vsel %vm1556_vm0, 1.0, %v5137_v59  ;;  %v3724_v60 = vmul.f32 %v381_v28, %v381_v28  ;;  %5145 = vst [vmem:[#allocation36_spill] sm:$0xff] %v3742_v43  ;;  %v3775_v32 = vsel %vm1558_vm4, 1.0, %v5137_v59 }
  0xeb   : > { %2740 = vperm.xlu1 %2738, %v3447_v8   ;;  %5142 = vst [vmem:[#allocation33_spill] sm:$0xff] %v3706_v4  ;;  %5143 = vst [vmem:[#allocation34_spill] sm:$0xff] %v3710_v52  ;;  %v3716_v8 = vmul.f32 %v378_v35, %v378_v35  ;;  %v3746_v28 = vmul.f32 %v386_v22, %v386_v22  ;;  %v5149_v4 = vld [vmem:[#allocation9_spill] sm:$0xff]  ;;  %v3762_v16 = vmul.f32 %v388_v61, %v388_v61  ;;  %v5156_v61 = vld [vmem:[#allocation10_spill] sm:$0xff]  ;;  %v5157_v40 = vmov 1  }
  0xec   : > { %v389_v52 = vsub.f32 %v5149_v4, %v3584_v18  ;;  %v3772_v4 = vsel %vm1557_vm3, 1.0, %v5137_v59  ;;  %5155 = vst [vmem:[#allocation39_spill] sm:$0xff] %v3775_v32  ;;  %v392_v51 = vsub.f32 %v3395_v57, %v3584_v18  ;;  %vm1467_vm5 = vcmp.gt.f32.partialorder %v1435_v49, 0.0 }
  0xed   : > { %5146 = vst [vmem:[#allocation37_spill] sm:$0xff] %v3746_v28  ;;  %5154 = vst [vmem:[#allocation38_spill] sm:$0xff] %v3772_v4  ;;  %vm1468_vm6 = vcmp.gt.f32.partialorder %v1436_v33, 0.0  ;;  %vm1563_vm8 = vcmp.gt.f32.partialorder %v1435_v49, 0.5  ;;  %vm1564_vm9 = vcmp.gt.f32.partialorder %v1436_v33, 0.5  ;;  %v396_v49 = vsub.f32 %v3425_v45, %v3584_v18 }
  0xee   : > { %v3730_v39 = vpop.permute.xlu1 %466  ;;  %v3732_v25 = vpop.permute.xlu0 %470  ;;  %2850 = vperm.xlu0 %2722, %v3393_v50   ;;  %v5147_v50 = vld [vmem:[#allocation7_spill] sm:$0xff]  ;;  %v3792_v57 = vmul.f32 %v389_v52, %v389_v52  ;;  %v400_v45 = vsub.f32 %v3457_v37, %v3584_v18  ;;  %v404_v37 = vsub.f32 %v3488_v13, %v3584_v18 }
  0xef   : > { %2745 = vperm.xlu1 %2738, %v3463_v0   ;;  %v387_v35 = vsub.f32 %v5147_v50, %v3584_v18  ;;  %v5148_v0 = vld [vmem:[#allocation8_spill] sm:$0xff]  ;;  %5150 = vst [vmem:[#allocation7_spill] sm:$0xff] %v3762_v16  ;;  %v5153_v50 = vmov 3   ;;  %v391_v16 = vsub.f32 %v5156_v61, %v3584_v18 }
  0xf0   : > { %v390_v14 = vsub.f32 %v5148_v0, %v3584_v18  ;;  %v393_v0 = vsub.f32 %v3412_v2, %v3584_v18 }
  0xf1   : > { %v3788_v43 = vmul.f32 %v387_v35, %v387_v35  ;;  %v3803_v35 = vmul.f32 %v392_v51, %v392_v51  ;;  %v395_v51 = vsub.f32 %v3427_v56, %v3584_v18  ;;  %v399_v56 = vsub.f32 %v3459_v12, %v3584_v18 }
  0xf2   : > { %v3764_v22 = vpop.permute.xlu1 %474  ;;  %v3766_v15 = vpop.permute.xlu0 %478  ;;  %2854 = vset.pattern.permute.xlu0 %v5153_v50  ;;  %v3790_v28 = vmul.f32 %v390_v14, %v390_v14  ;;  %v3805_v14 = vmul.f32 %v391_v16, %v391_v16  ;;  %v3827_v16 = vsel %vm1563_vm8, 1.0, %v5137_v59  ;;  %v403_v12 = vsub.f32 %v3490_v5, %v3584_v18 }
  0xf3   : > { %5151 = vst [vmem:[#allocation8_spill] sm:$0xff] %v3764_v22  ;;  %5152 = vst [vmem:[#allocation9_spill] sm:$0xff] %v3766_v15  ;;  %2856 = vperm.xlu0 %2854, %v3414_v46   ;;  %v865_v15 = vld [vmem:[%s3572_s3 + $0x2] sm:$0x1]  ;;  %v394_v22 = vsub.f32 %v3410_v55, %v3584_v18  ;;  %2749 = vset.pattern.permute.xlu1 %v5157_v40  ;;  %v5158_v46 = vpack.i.bf16 %v3587_v58, %v3581_v27  ;;  %v3809_v27 = vsel %vm1467_vm5, 1.0, %v5137_v59 }
  0xf4   : > { %vm866_vm7 = vcmp.gt.f32.partialorder %v865_v15, 0.5  ;;  %5159 = vst [vmem:[#allocation10_spill] sm:$0xff] %v3809_v27  ;;  %v3812_v58 = vsel %vm1468_vm6, 1.0, %v5137_v59  ;;  %5161 = vst [vmem:[#allocation41_spill] sm:$0xff] %v3827_v16  ;;  %v397_v15 = vsub.f32 %v3442_v47, %v3584_v18  ;;  %v5163_v55 = vpack.i.bf16 %v3593_v31, %v3590_v42 }
  0xf5   : > { %2751 = vperm.xlu1 %2749, %v5158_v46   ;;  %5160 = vst [vmem:[#allocation40_spill] sm:$0xff] %v3812_v58  ;;  %v3814_v52 = vmul.f32 %v394_v22, %v394_v22  ;;  %v3816_v46 = vmul.f32 %v393_v0, %v393_v0  ;;  %v2408_v33 = vsel %vm866_vm7, 1.0, %v5137_v59  ;;  %v3830_v22 = vsel %vm1564_vm9, 1.0, %v5137_v59  ;;  %v3841_v0 = vld [vmem:[%s3572_s3 + $0x5] ss:$0 sm:$0xff] }
  0xf6   : > { %v3799_v61 = vpop.permute.xlu1 %482  ;;  %v3801_v2 = vpop.permute.xlu0 %486  ;;  %5162 = vst [vmem:[#allocation42_spill] sm:$0xff] %v3830_v22  ;;  %v401_v47 = vsub.f32 %v3475_v3, %v3584_v18  ;;  %v3859_v42 = vmul.f32 %v396_v49, %v396_v49  ;;  %v3861_v31 = vmul.f32 %v395_v51, %v395_v51  ;;  %v3866_v3 = vrot.slane %v2408_v33, %v3661_v36 }
  0xf7   : > { %2861 = vperm.xlu0 %2854, %v3430_v63   ;;  %v398_v63 = vsub.f32 %v3440_v62, %v3584_v18  ;;  %v402_v62 = vsub.f32 %v3473_v7, %v3584_v18  ;;  %v542_v5 = vsub.f32 %v3528_v26, %v3841_v0  ;;  %v3876_v7 = vmul.f32 %v397_v15, %v397_v15  ;;  %v1629_v26 = vld [vmem:[%s3572_s3 + $0x1] sm:$0x1] }
  0xf8   : > { %5164 = vst [vmem:[#allocation43_spill] sm:$0xff] %v3866_v3  ;;  %v3878_v51 = vmul.f32 %v400_v45, %v400_v45  ;;  %v3880_v27 = vmul.f32 %v399_v56, %v399_v56  ;;  %v3890_v3 = vmul.f32 %v401_v47, %v401_v47  ;;  %v3894_v49 = vmul.f32 %v403_v12, %v403_v12  ;;  %v5174_v12 = vld [vmem:[#allocation15_spill] sm:$0xff] }
  0xf9   : > { %2760 = vset.pattern.permute.xlu1 %v5153_v50  ;;  %v3868_v13 = vmul.f32 %v398_v63, %v398_v63  ;;  %v405_v15 = vsub.f32 %v3505_v19, %v3584_v18  ;;  %v407_v56 = vsub.f32 %v3518_v6, %v3584_v18  ;;  %v544_v22 = vsub.f32 %v5174_v12, %v3841_v0  ;;  %v5175_v19 = vld [vmem:[#allocation16_spill] sm:$0xff]  ;;  %v5178_v6 = vld [vmem:[#allocation19_spill] sm:$0xff] }
  0xfa   : > { %2762 = vperm.xlu1 %2760, %v5163_v55   ;;  %v3846_v4 = vpop.permute.xlu1 %490  ;;  %v3848_v32 = vpop.permute.xlu0 %494  ;;  %v406_v55 = vsub.f32 %v3503_v17, %v3584_v18  ;;  %5166 = vst [vmem:[#allocation45_spill] sm:$0xff] %v3878_v51  ;;  %5167 = vst [vmem:[#allocation46_spill] sm:$0xff] %v3880_v27  ;;  %v3882_v17 = vmul.f32 %v402_v62, %v402_v62  ;;  %v5173_v62 = vld [vmem:[#allocation14_spill] sm:$0xff]  ;;  %vm1630_vm10 = vcmp.gt.f32.partialorder %v1629_v26, 0.0  ;;  %v5180_v12 = vld [vmem:[#allocation20_spill] sm:$0xff] }
  0xfb   : > { %2866 = vperm.xlu0 %2854, %v3493_v11   ;;  %5165 = vst [vmem:[#allocation44_spill] sm:$0xff] %v3868_v13  ;;  %v541_v11 = vsub.f32 %v3530_v20, %v3841_v0  ;;  %5169 = vst [vmem:[#allocation48_spill] sm:$0xff] %v3890_v3  ;;  %v3892_v20 = vmul.f32 %v404_v37, %v404_v37  ;;  %v543_v47 = vsub.f32 %v5173_v62, %v3841_v0  ;;  %v5185_v3 = vld [vmem:[#allocation13_spill] sm:$0xff]  ;;  %v2176_v27 = vld [vmem:[%s3572_s3] sm:$0x1] }
  0xfc   : > { %5168 = vst [vmem:[#allocation47_spill] sm:$0xff] %v3882_v17  ;;  %5171 = vst [vmem:[#allocation50_spill] sm:$0xff] %v3894_v49  ;;  %v3899_v45 = vmul.f32 %v406_v55, %v406_v55  ;;  %v606_v37 = vmul.f32 %v542_v5, %v542_v5  ;;  %v5176_v55 = vld [vmem:[#allocation17_spill] sm:$0xff]  ;;  %v3922_v62 = vmul.f32 %v405_v15, %v405_v15  ;;  %v5184_v15 = vld [vmem:[#allocation27_spill] sm:$0xff] }
  0xfd   : > { %5170 = vst [vmem:[#allocation49_spill] sm:$0xff] %v3892_v20  ;;  %v605_v16 = vmul.f32 %v541_v11, %v541_v11  ;;  %v546_v58 = vsub.f32 %v5176_v55, %v3841_v0  ;;  %v5181_v20 = vld [vmem:[#allocation21_spill] sm:$0xff]  ;;  %v607_v17 = vmul.f32 %v543_v47, %v543_v47 }
  0xfe   : > { %2767 = vperm.xlu1 %2760, %v3445_v48   ;;  %v3885_v63 = vpop.permute.xlu1 %498  ;;  %v3887_v33 = vpop.permute.xlu0 %502  ;;  %5172 = vst [vmem:[#allocation51_spill] sm:$0xff] %v3899_v45  ;;  %v408_v48 = vsub.f32 %v3516_v21, %v3584_v18  ;;  %v5177_v21 = vld [vmem:[#allocation18_spill] sm:$0xff]  ;;  %v548_v18 = vsub.f32 %v5178_v6, %v3841_v0  ;;  %5179 = vst [vmem:[#allocation14_spill] sm:$0xff] %v3922_v62  ;;  %v550_v55 = vsub.f32 %v5181_v20, %v3841_v0 }
  0xff   : > { %2871 = vperm.xlu0 %2854, %v3521_v23   ;;  %v545_v23 = vsub.f32 %v5175_v19, %v3841_v0  ;;  %v547_v45 = vsub.f32 %v5177_v21, %v3841_v0  ;;  %v549_v19 = vsub.f32 %v5180_v12, %v3841_v0  ;;  %v551_v21 = vsub.f32 %v3647_v38, %v3841_v0 }
 0x100   : > { %v5182_v6 = vpack.i.bf16 %v3607_v30, %v3603_v1  ;;  %v3933_v49 = vmul.f32 %v408_v48, %v408_v48  ;;  %v552_v62 = vsub.f32 %v5184_v15, %v3841_v0  ;;  %v2473_v12 = vsel %vm1630_vm10, 1.0, %v5137_v59 }
 0x101   : > { %v3940_v20 = vmul.f32 %v407_v56, %v407_v56  ;;  %v3943_v38 = vadd.f32 %v606_v37, %v3716_v8  ;;  %v3946_v1 = vadd.f32 %v605_v16, %v3668_v34  ;;  %v608_v30 = vmul.f32 %v544_v22, %v544_v22  ;;  %v5186_v22 = vld [vmem:[#allocation22_spill] sm:$0xff]  ;;  %v5188_v37 = vld [vmem:[#allocation31_spill] sm:$0xff] }
 0x102   : > { %2776 = vset.pattern.permute.xlu1 %v5157_v40  ;;  %v3918_v5 = vpop.permute.xlu1 %506  ;;  %v3920_v11 = vpop.permute.xlu0 %510  ;;  %5183 = vst [vmem:[#allocation15_spill] sm:$0xff] %v3933_v49  ;;  %v609_v48 = vmul.f32 %v545_v23, %v545_v23  ;;  %v611_v47 = vmul.f32 %v547_v45, %v547_v45  ;;  %v612_v49 = vmul.f32 %v548_v18, %v548_v18 }
 0x103   : > { %2778 = vperm.xlu1 %2776, %v5182_v6   ;;  %2882 = vperm.xlu0 %2854, %v5185_v3   ;;  %v610_v6 = vmul.f32 %v546_v58, %v546_v58  ;;  %v613_v3 = vmul.f32 %v549_v19, %v549_v19  ;;  %v614_v13 = vmul.f32 %v550_v55, %v550_v55 }
 0x104   : > { %v615_v26 = vmul.f32 %v551_v21, %v551_v21  ;;  %v3951_v56 = vrot.slane %v2473_v12, %v3661_v36  ;;  %v3954_v8 = vadd.f32 %v607_v17, %v3666_v29  ;;  %v616_v34 = vmul.f32 %v552_v62, %v552_v62  ;;  %v5191_v12 = vld [vmem:[#allocation7_spill] sm:$0xff] }
 0x105   : > { %v553_v58 = vsub.f32 %v3684_v24, %v3841_v0  ;;  %v554_v16 = vsub.f32 %v3686_v44, %v3841_v0  ;;  %v5187_v45 = vpack.i.bf16 %v3616_v10, %v5186_v22  ;;  %v3964_v23 = vadd.f32 %v608_v30, %v5188_v37 }
 0x106   : > { %v515_v51 = vpop.permute.xlu1 %514  ;;  %v519_v15 = vpop.permute.xlu0 %518  ;;  %v555_v18 = vsub.f32 %v3730_v39, %v3841_v0  ;;  %v556_v29 = vsub.f32 %v3732_v25, %v3841_v0  ;;  %v3970_v17 = vmul.f32 -1.442695, %v2176_v27  ;;  %v3973_v24 = vadd.f32 %v609_v48, %v3724_v60  ;;  %v5189_v25 = vld [vmem:[#allocation37_spill] sm:$0xff] }
 0x107   : > { %2782 = vset.pattern.permute.xlu1 %v5153_v50  ;;  %v3976_v44 = vadd.f32 %v610_v6, %v3718_v9  ;;  %v3979_v10 = vadd.f32 %v611_v47, %v3744_v54  ;;  %v3982_v62 = vadd.f32 %v612_v49, %v3726_v53  ;;  %v3985_v39 = vadd.f32 %v613_v3, %v3748_v41  ;;  %v5190_v9 = vld [vmem:[#allocation8_spill] sm:$0xff]  ;;  %v5192_v49 = vld [vmem:[#allocation9_spill] sm:$0xff]  ;;  %v5194_v3 = vld [vmem:[#allocation23_spill] sm:$0xff] }
 0x108   : > { %2784 = vperm.xlu1 %2782, %v5187_v45   ;;  %v3988_v27 = vadd.f32 %v614_v13, %v5189_v25  ;;  %v3991_v60 = vadd.f32 %v615_v26, %v3788_v43  ;;  %v557_v21 = vsub.f32 %v5190_v9, %v3841_v0  ;;  %v3996_v54 = vadd.f32 %v616_v34, %v5191_v12  ;;  %v5193_v47 = vld [vmem:[#allocation24_spill] sm:$0xff] }
 0x109   : > { %v617_v30 = vmul.f32 %v553_v58, %v553_v58  ;;  %v618_v53 = vmul.f32 %v554_v16, %v554_v16  ;;  %v558_v48 = vsub.f32 %v5192_v49, %v3841_v0  ;;  %v619_v41 = vmul.f32 %v555_v18, %v555_v18 }
 0x10a   : > { %v523_v19 = vpop.permute.xlu1 %522  ;;  %v527_v55 = vpop.permute.xlu0 %526  ;;  %v620_v6 = vmul.f32 %v556_v29, %v556_v29  ;;  %v559_v13 = vsub.f32 %v3799_v61, %v3841_v0  ;;  %v560_v43 = vsub.f32 %v3801_v2, %v3841_v0  ;;  %v5195_v26 = vpack.i.bf16 %v5193_v47, %v5194_v3 }
 0x10b   : > { %v561_v34 = vsub.f32 %v3846_v4, %v3841_v0  ;;  %v562_v58 = vsub.f32 %v3848_v32, %v3841_v0  ;;  %v563_v16 = vsub.f32 %v3885_v63, %v3841_v0  ;;  %v564_v22 = vsub.f32 %v3887_v33, %v3841_v0 }
 0x10c   : > { %2788 = vset.pattern.permute.xlu1 %v5157_v40  ;;  %v621_v2 = vmul.f32 %v557_v21, %v557_v21  ;;  %v565_v37 = vsub.f32 %v3918_v5, %v3841_v0  ;;  %v566_v18 = vsub.f32 %v3920_v11, %v3841_v0  ;;  %v567_v4 = vsub.f32 %v515_v51, %v3841_v0 }
 0x10d   : > { %2790 = vperm.xlu1 %2788, %v5195_v26   ;;  %v4024_v32 = vadd.f32 %v617_v30, %v3792_v57  ;;  %v4027_v63 = vadd.f32 %v618_v53, %v3790_v28  ;;  %v622_v29 = vmul.f32 %v558_v48, %v558_v48  ;;  %v568_v33 = vsub.f32 %v519_v15, %v3841_v0  ;;  %v5196_v30 = vld [vmem:[#allocation26_spill] sm:$0xff]  ;;  %v5197_v28 = vld [vmem:[#allocation25_spill] sm:$0xff] }
 0x10e   : > { %v531_v61 = vpop.permute.xlu1 %530  ;;  %v4016_v45 = vpop.permute.xlu0 %534  ;;  %v4031_v25 = vadd.f32 %v619_v41, %v3805_v14  ;;  %v4034_v9 = vadd.f32 %v620_v6, %v3803_v35  ;;  %v623_v5 = vmul.f32 %v559_v13, %v559_v13  ;;  %v624_v21 = vmul.f32 %v560_v43, %v560_v43 }
 0x10f   : > { %v625_v51 = vmul.f32 %v561_v34, %v561_v34  ;;  %v626_v11 = vmul.f32 %v562_v58, %v562_v58  ;;  %v627_v57 = vmul.f32 %v563_v16, %v563_v16  ;;  %v628_v12 = vmul.f32 %v564_v22, %v564_v22  ;;  %v5199_v16 = vld [vmem:[#allocation44_spill] sm:$0xff] }
 0x110   : > { %v5198_v53 = vpack.i.bf16 %v5196_v30, %v5197_v28  ;;  %v4041_v15 = vadd.f32 %v621_v2, %v3816_v46  ;;  %v629_v14 = vmul.f32 %v565_v37, %v565_v37  ;;  %v630_v49 = vmul.f32 %v566_v18, %v566_v18  ;;  %v5201_v37 = vld [vmem:[#allocation45_spill] sm:$0xff] }
 0x111   : > { %2799 = vset.pattern.permute.xlu1 %v5153_v50  ;;  %v631_v48 = vmul.f32 %v567_v4, %v567_v4  ;;  %v4046_v6 = vadd.f32 %v622_v29, %v3814_v52  ;;  %v632_v13 = vmul.f32 %v568_v33, %v568_v33  ;;  %v4049_v3 = vadd.f32 %v623_v5, %v3861_v31  ;;  %v5200_v52 = vld [vmem:[#allocation46_spill] sm:$0xff]  ;;  %v5202_v31 = vld [vmem:[#allocation11_spill] sm:$0xff]  ;;  %v5206_v33 = vld [vmem:[#allocation32_spill] sm:$0xff] }
 0x112   : > { %2801 = vperm.xlu1 %2799, %v5198_v53   ;;  %v4052_v26 = vadd.f32 %v624_v21, %v3859_v42  ;;  %v569_v46 = vsub.f32 %v523_v19, %v3841_v0  ;;  %v570_v34 = vsub.f32 %v527_v55, %v3841_v0  ;;  %v4057_v58 = vadd.f32 %v625_v51, %v3876_v7  ;;  %v5203_v42 = vld [vmem:[#allocation48_spill] sm:$0xff]  ;;  %v5204_v19 = vld [vmem:[#allocation47_spill] sm:$0xff]  ;;  %v5205_v55 = vld [vmem:[#allocation50_spill] sm:$0xff] }
 0x113   : > { %v4043_v35 = vpop.permute.xlu0 %2560  ;;  %v2555_v41 = vpop.permute.xlu1 %2554  ;;  %v4060_v22 = vadd.f32 %v626_v11, %v5199_v16  ;;  %v4063_v2 = vadd.f32 %v627_v57, %v5200_v52  ;;  %v4066_v18 = vadd.f32 %v628_v12, %v5201_v37  ;;  %v4070_v4 = vadd.f32 %v629_v14, %v5203_v42  ;;  %v5209_v11 = vld [vmem:[#allocation49_spill] sm:$0xff] }
 0x114   : > { %v2557_v43 = vunpack.i.h.bf16 %v2555_v41  ;;  %v2556_v47 = vunpack.i.l.bf16 %v2555_v41  ;;  %v4073_v29 = vadd.f32 %v630_v49, %v5204_v19  ;;  %v4076_v7 = vadd.f32 %v631_v48, %v5205_v55  ;;  %v5215_v16 = vld [vmem:[#allocation29_spill] sm:$0xff] }
 0x115   : > { %v4084_v57 = vadd.f32 %v632_v13, %v5209_v11  ;;  %v633_v53 = vmul.f32 %v569_v46, %v569_v46  ;;  %v634_v14 = vmul.f32 %v570_v34, %v570_v34  ;;  %v571_v41 = vsub.f32 %v531_v61, %v3841_v0  ;;  %v5214_v34 = vld [vmem:[#allocation30_spill] sm:$0xff] }
 0x116   : > { %2806 = vperm.xlu1 %2799, %v5202_v31   ;;  %vm4079_vm11 = vcmp.ne.f32.partialorder %v2556_v47, %v5206_v33  ;;  %vm4087_vm12 = vcmp.ne.f32.partialorder %v2557_v43, %v5206_v33  ;;  %v2562_v47 = vunpack.i.l.bf16 %v4043_v35  ;;  %v5216_v52 = vpack.i.bf16 %v5214_v34, %v5215_v16  ;;  %v5241_v16 = vld [vmem:[#allocation35_spill] sm:$0xff] }
 0x117   : > { %v2576_v21 = vpop.permute.xlu0 %2575  ;;  %v2566_v51 = vpop.permute.xlu1 %2565  ;;  %v1065_v13 = vsel %vm4079_vm11, %v3946_v1, 1e+09  ;;  %v1066_v43 = vsel %vm4087_vm12, %v3943_v38, 1e+09  ;;  %v2563_v11 = vunpack.i.h.bf16 %v4043_v35  ;;  %v635_v35 = vmul.f32 %v571_v41, %v571_v41 }
 0x118   : > { %v2578_v30 = vunpack.i.h.bf16 %v2576_v21  ;;  %v2568_v28 = vunpack.i.h.bf16 %v2566_v51  ;;  %v2577_v49 = vunpack.i.l.bf16 %v2576_v21  ;;  %v2567_v48 = vunpack.i.l.bf16 %v2566_v51  ;;  %v5217_v21 = vld [vmem:[#allocation14_spill] sm:$0xff] }
 0x119   : > { %v4113_v51 = vadd.f32 %v633_v53, %v5217_v21  ;;  %v5222_v53 = vld [vmem:[#allocation51_spill] sm:$0xff]  ;;  %vm4141_vm3 = vcmp.ne.f32.partialorder %v2562_v47, %v5206_v33  ;;  %vm4152_vm4 = vcmp.ne.f32.partialorder %v2563_v11, %v5206_v33  ;;  %2892 = vpow2.f32 %v3970_v17 }
 0x11a   : > { %vm1038_vm13 = vcmp.ne.f32.partialorder %v2568_v28, %v5206_v33  ;;  %2815 = vset.pattern.permute.xlu1 %v5157_v40  ;;  %vm4102_vm14 = vcmp.ne.f32.partialorder %v2578_v30, %v5206_v33  ;;  %vm1037_vm15 = vcmp.ne.f32.partialorder %v2567_v48, %v5206_v33  ;;  %vm4117_vm0 = vcmp.ne.f32.partialorder %v2577_v49, %v5206_v33 }
 0x11b   : > { %v1070_v61 = vsel %vm1038_vm13, %v3976_v44, 1e+09  ;;  %2817 = vperm.xlu1 %2815, %v5216_v52   ;;  %v2586_v37 = vpop.permute.xlu0 %2585  ;;  %v2571_v31 = vpop.permute.xlu1 %2570  ;;  %v1069_v42 = vsel %vm1037_vm15, %v3973_v24, 1e+09  ;;  %v572_v28 = vsub.f32 %v4016_v45, %v3841_v0  ;;  %v4129_v34 = vadd.f32 %v634_v14, %v5222_v53  ;;  %v5227_v52 = vld [vmem:[#allocation34_spill] sm:$0xff] }
 0x11c   : > { %v1327_v19 = vmin.f32 %v1066_v43, %v1070_v61  ;;  %v2588_v55 = vunpack.i.h.bf16 %v2586_v37  ;;  %v2587_v5 = vunpack.i.l.bf16 %v2586_v37  ;;  %v1326_v30 = vmin.f32 %v1065_v13, %v1069_v42  ;;  %v5228_v37 = vld [vmem:[#allocation33_spill] sm:$0xff] }
 0x11d   : > { %v2573_v43 = vunpack.i.h.bf16 %v2571_v31  ;;  %v2572_v61 = vunpack.i.l.bf16 %v2571_v31  ;;  %v1074_v49 = vsel %vm4102_vm14, %v3988_v27, 1e+09  ;;  %v1073_v14 = vsel %vm4117_vm0, %v3985_v39, 1e+09 }
 0x11e   : > { %vm4124_vm1 = vcmp.ne.f32.partialorder %v2588_v55, %v5206_v33  ;;  %vm4135_vm2 = vcmp.ne.f32.partialorder %v2587_v5, %v5206_v33  ;;  %v1331_v41 = vmin.f32 %v1327_v19, %v1074_v49  ;;  %v5229_v31 = vpack.i.bf16 %v5227_v52, %v5228_v37  ;;  %v5240_v52 = vld [vmem:[#allocation36_spill] sm:$0xff] }
 0x11f   : > { %2821 = vset.pattern.permute.xlu1 %v5153_v50  ;;  %v2596_v0 = vpop.permute.xlu0 %2595  ;;  %v2581_v45 = vpop.permute.xlu1 %2580  ;;  %v1078_v47 = vsel %vm4124_vm1, %v4027_v63, 1e+09  ;;  %v1330_v55 = vmin.f32 %v1326_v30, %v1073_v14  ;;  %v4159_v21 = vmul.f32 %v572_v28, %v572_v28  ;;  %v1077_v19 = vsel %vm4135_vm2, %v4024_v32, 1e+09 }
 0x120   : > { %v2598_v46 = vunpack.i.h.bf16 %v2596_v0  ;;  %2823 = vperm.xlu1 %2821, %v5229_v31   ;;  %v2597_v5 = vunpack.i.l.bf16 %v2596_v0  ;;  %vm4165_vm5 = vcmp.ne.f32.partialorder %v2572_v61, %v5206_v33  ;;  %vm4170_vm6 = vcmp.ne.f32.partialorder %v2573_v43, %v5206_v33 }
 0x121   : > { %v2583_v48 = vunpack.i.h.bf16 %v2581_v45  ;;  %v2582_v61 = vunpack.i.l.bf16 %v2581_v45  ;;  %v4185_v13 = vadd.f32 %v635_v35, %v3940_v20  ;;  %v1067_v43 = vsel %vm4141_vm3, %v3954_v8, 1e+09 }
 0x122   : > { %vm4175_vm7 = vcmp.ne.f32.partialorder %v2597_v5, %v5206_v33  ;;  %vm4180_vm8 = vcmp.ne.f32.partialorder %v2598_v46, %v5206_v33  ;;  %v1068_v0 = vsel %vm4152_vm4, %v3964_v23, 1e+09  ;;  %v1335_v14 = vmin.f32 %v1331_v41, %v1078_v47 }
 0x123   : > { %v2606_v53 = vpop.permute.xlu0 %2605  ;;  %v2591_v49 = vpop.permute.xlu1 %2590  ;;  %v1334_v46 = vmin.f32 %v1330_v55, %v1077_v19  ;;  %v1071_v45 = vsel %vm4165_vm5, %v3979_v10, 1e+09  ;;  %v1072_v20 = vsel %vm4170_vm6, %v3982_v62, 1e+09  ;;  %v5242_v37 = vpack.i.bf16 %v5240_v52, %v5241_v16 }
 0x124   : > { %2827 = vset.pattern.permute.xlu1 %v5157_v40  ;;  %v2608_v35 = vunpack.i.h.bf16 %v2606_v53  ;;  %v1081_v41 = vsel %vm4175_vm7, %v4041_v15, 1e+09  ;;  %v1082_v31 = vsel %vm4180_vm8, %v4046_v6, 1e+09  ;;  %v2607_v42 = vunpack.i.l.bf16 %v2606_v53 }
 0x125   : > { %2829 = vperm.xlu1 %2827, %v5242_v37   ;;  %v2593_v47 = vunpack.i.h.bf16 %v2591_v49  ;;  %vm4210_vm9 = vcmp.ne.f32.partialorder %v2582_v61, %v5206_v33  ;;  %vm4215_vm10 = vcmp.ne.f32.partialorder %v2583_v48, %v5206_v33  ;;  %v2592_v12 = vunpack.i.l.bf16 %v2591_v49 }
 0x126   : > { %vm4220_vm11 = vcmp.ne.f32.partialorder %v2608_v35, %v5206_v33  ;;  %v1328_v28 = vmin.f32 %v1067_v43, %v1071_v45  ;;  %v1329_v53 = vmin.f32 %v1068_v0, %v1072_v20  ;;  %vm4225_vm12 = vcmp.ne.f32.partialorder %v2607_v42, %v5206_v33  ;;  %v5255_v45 = vld [vmem:[#allocation39_spill] sm:$0xff]  ;;  %v5256_v20 = vld [vmem:[#allocation38_spill] sm:$0xff] }
 0x127   : > { %v2616_v11 = vpop.permute.xlu0 %2615  ;;  %v2601_v30 = vpop.permute.xlu1 %2600  ;;  %v1338_v48 = vmin.f32 %v1334_v46, %v1081_v41  ;;  %v1339_v16 = vmin.f32 %v1335_v14, %v1082_v31  ;;  %vm4230_vm13 = vcmp.ne.f32.partialorder %v2592_v12, %v5206_v33  ;;  %vm4235_vm14 = vcmp.ne.f32.partialorder %v2593_v47, %v5206_v33 }
 0x128   : > { %v2618_v52 = vunpack.i.h.bf16 %v2616_v11  ;;  %v1075_v43 = vsel %vm4210_vm9, %v3991_v60, 1e+09  ;;  %v1076_v0 = vsel %vm4215_vm10, %v3996_v54, 1e+09  ;;  %v1086_v14 = vsel %vm4220_vm11, %v4060_v22, 1e+09 }
 0x129   : > { %2838 = vset.pattern.permute.xlu1 %v5153_v50  ;;  %v2617_v46 = vunpack.i.l.bf16 %v2616_v11  ;;  %v5257_v35 = vpack.i.bf16 %v5255_v45, %v5256_v20  ;;  %v1085_v41 = vsel %vm4225_vm12, %v4057_v58, 1e+09  ;;  %v2603_v42 = vunpack.i.h.bf16 %v2601_v30 }
 0x12a   : > { %vm4256_vm15 = vcmp.ne.f32.partialorder %v2618_v52, %v5206_v33  ;;  %v2602_v47 = vunpack.i.l.bf16 %v2601_v30  ;;  %v1079_v19 = vsel %vm4230_vm13, %v4031_v25, 1e+09  ;;  %v1080_v12 = vsel %vm4235_vm14, %v4034_v9, 1e+09 }
 0x12b   : > { %2840 = vperm.xlu1 %2838, %v5257_v35   ;;  %v2626_v55 = vpop.permute.xlu0 %2625  ;;  %v2611_v5 = vpop.permute.xlu1 %2610  ;;  %v1332_v45 = vmin.f32 %v1328_v28, %v1075_v43  ;;  %v1333_v20 = vmin.f32 %v1329_v53, %v1076_v0  ;;  %vm4267_vm0 = vcmp.ne.f32.partialorder %v2617_v46, %v5206_v33  ;;  %vm4272_vm1 = vcmp.ne.f32.partialorder %v2603_v42, %v5206_v33  ;;  %v5266_v53 = vld [vmem:[#allocation12_spill] sm:$0xff]  ;;  %v5276_v28 = vld [vmem:[#allocation10_spill] sm:$0xff] }
 0x12c   : > { %v2628_v11 = vunpack.i.h.bf16 %v2626_v55  ;;  %v2627_v61 = vunpack.i.l.bf16 %v2626_v55  ;;  %v1342_v37 = vmin.f32 %v1338_v48, %v1085_v41  ;;  %v1343_v35 = vmin.f32 %v1339_v16, %v1086_v14  ;;  %v5278_v41 = vld [vmem:[#allocation15_spill] sm:$0xff] }
 0x12d   : > { %v1090_v49 = vsel %vm4256_vm15, %v4073_v29, 1e+09  ;;  %vm4280_vm2 = vcmp.ne.f32.partialorder %v2602_v47, %v5206_v33  ;;  %v1336_v43 = vmin.f32 %v1332_v45, %v1079_v19  ;;  %v1337_v0 = vmin.f32 %v1333_v20, %v1080_v12 }
 0x12e   : > { %v1084_v46 = vsel %vm4272_vm1, %v4052_v26, 1e+09  ;;  %vm4289_vm3 = vcmp.ne.f32.partialorder %v2627_v61, %v5206_v33  ;;  %v1089_v14 = vsel %vm4267_vm0, %v4070_v4, 1e+09  ;;  %vm4297_vm4 = vcmp.ne.f32.partialorder %v2628_v11, %v5206_v33 }
 0x12f   : > { %2845 = vperm.xlu1 %2838, %v5266_v53   ;;  %v2621_v16 = vpop.permute.xlu1 %2620  ;;  %v2613_v31 = vunpack.i.h.bf16 %v2611_v5  ;;  %v2612_v42 = vunpack.i.l.bf16 %v2611_v5  ;;  %v1347_v55 = vmin.f32 %v1343_v35, %v1090_v49  ;;  %v1083_v19 = vsel %vm4280_vm2, %v4049_v3, 1e+09  ;;  %v5275_v49 = vld [vmem:[#allocation40_spill] sm:$0xff]  ;;  %v5280_v35 = vld [vmem:[#allocation42_spill] sm:$0xff] }
 0x130   : > { %v2637_v47 = vpop.permute.xlu0 %2636  ;;  %v2623_v12 = vunpack.i.h.bf16 %v2621_v16  ;;  %v2622_v61 = vunpack.i.l.bf16 %v2621_v16  ;;  %v1341_v45 = vmin.f32 %v1337_v0, %v1084_v46  ;;  %v1093_v20 = vsel %vm4289_vm3, %v4113_v51, 1e+09 }
 0x131   : > { %vm4308_vm5 = vcmp.ne.f32.partialorder %v2612_v42, %v5206_v33  ;;  %vm1056_vm6 = vcmp.ne.f32.partialorder %v2613_v31, %v5206_v33  ;;  %v1094_v5 = vsel %vm4297_vm4, %v4129_v34, 1e+09  ;;  %v5277_v53 = vpack.i.bf16 %v5275_v49, %v5276_v28 }
 0x132   : > { %v1087_v52 = vsel %vm4308_vm5, %v4063_v2, 1e+09  ;;  %v1088_v30 = vsel %vm1056_vm6, %v4066_v18, 1e+09  ;;  %vm4322_vm7 = vcmp.ne.f32.partialorder %v2622_v61, %v5206_v33  ;;  %v1346_v0 = vmin.f32 %v1342_v37, %v1089_v14 }
 0x133   : > { %2875 = vset.pattern.permute.xlu1 %v5157_v40  ;;  %v2631_v40 = vpop.permute.xlu1 %2630  ;;  %v1340_v46 = vmin.f32 %v1336_v43, %v1083_v19  ;;  %v1345_v48 = vmin.f32 %v1341_v45, %v1088_v30  ;;  %vm1060_vm8 = vcmp.ne.f32.partialorder %v2623_v12, %v5206_v33  ;;  %v4332_v31 = vadd.f32 %v4159_v21, %v5278_v41  ;;  %v5281_v41 = vld [vmem:[#allocation41_spill] sm:$0xff] }
 0x134   : > { %2877 = vperm.xlu1 %2875, %v5277_v53   ;;  %v2653_v16 = vpop.permute.xlu0 %2652  ;;  %v1091_v42 = vsel %vm4322_vm7, %v4076_v7, 1e+09  ;;  %v1092_v61 = vsel %vm1060_vm8, %v4084_v57, 1e+09  ;;  %v2633_v11 = vunpack.i.h.bf16 %v2631_v40  ;;  %v1350_v49 = vmin.f32 %v1346_v0, %v1093_v20 }
 0x135   : > { %5279 = vst [vmem:[#allocation16_spill] sm:$0xff] %v4332_v31  ;;  %v1351_v28 = vmin.f32 %v1347_v55, %v1094_v5  ;;  %v1344_v53 = vmin.f32 %v1340_v46, %v1087_v52  ;;  %v1349_v37 = vmin.f32 %v1345_v48, %v1092_v61  ;;  %v2632_v43 = vunpack.i.l.bf16 %v2631_v40  ;;  %v5283_v52 = vld [vmem:[#allocation43_spill] sm:$0xff] }
 0x136   : > { %vm1064_vm9 = vcmp.ne.f32.partialorder %v2633_v11, %v5206_v33  ;;  %v2655_v14 = vunpack.i.h.bf16 %v2653_v16  ;;  %v2654_v19 = vunpack.i.l.bf16 %v2653_v16  ;;  %v2639_v12 = vunpack.i.h.bf16 %v2637_v47 }
 0x137   : > { %v1348_v21 = vmin.f32 %v1344_v53, %v1091_v42  ;;  %v2638_v45 = vunpack.i.l.bf16 %v2637_v47  ;;  %v1096_v30 = vsel %vm1064_vm9, %v4332_v31, 1e+09  ;;  %v5282_v36 = vpack.i.bf16 %v5280_v35, %v5281_v41 }
 0x138   : > { %2886 = vset.pattern.permute.xlu1 %v5153_v50  ;;  %v2663_v20 = vpop.permute.xlu0 %2662  ;;  %v2643_v55 = vpop.permute.xlu1 %2642  ;;  %vm1063_vm10 = vcmp.ne.f32.partialorder %v2632_v43, %v5206_v33  ;;  %v1353_v5 = vmin.f32 %v1349_v37, %v1096_v30  ;;  %vm4346_vm11 = vcmp.ne.f32.partialorder %v2654_v19, %v5283_v52  ;;  %vm4351_vm12 = vcmp.ne.f32.partialorder %v2655_v14, %v5283_v52 }
 0x139   : > { %2888 = vperm.xlu1 %2886, %v5282_v36   ;;  %v1354_v47 = vmin.f32 %v1350_v49, %v1351_v28  ;;  %v1095_v0 = vsel %vm1063_vm10, %v4185_v13, 1e+09  ;;  %v2665_v46 = vunpack.i.h.bf16 %v2663_v20  ;;  %v2664_v48 = vunpack.i.l.bf16 %v2663_v20 }
 0x13a   : > { %v1352_v36 = vmin.f32 %v1348_v21, %v1095_v0  ;;  %v2645_v33 = vunpack.i.h.bf16 %v2643_v55  ;;  %v2644_v16 = vunpack.i.l.bf16 %v2643_v55  ;;  %vm4358_vm13 = vcmp.ne.f32.partialorder %v2638_v45, %v5283_v52 }
 0x13b   : > { %vm4363_vm14 = vcmp.ne.f32.partialorder %v2639_v12, %v5283_v52  ;;  %v1299_v11 = vsel %vm4346_vm11, %v3979_v10, 1e+09  ;;  %v1300_v17 = vsel %vm4351_vm12, %v3982_v62, 1e+09  ;;  %vm4374_vm15 = vcmp.ne.f32.partialorder %v2664_v48, %v5283_v52 }
 0x13c   : > { %v2673_v49 = vpop.permute.xlu0 %2672  ;;  %v2648_v28 = vpop.permute.xlu1 %2647  ;;  %v1355_v53 = vmin.f32 %v1352_v36, %v1353_v5  ;;  %vm4379_vm0 = vcmp.ne.f32.partialorder %v2665_v46, %v5283_v52  ;;  %vm1263_vm1 = vcmp.ne.f32.partialorder %v2644_v16, %v5283_v52  ;;  %v1303_v14 = vsel %vm4374_vm15, %v3991_v60, 1e+09 }
 0x13d   : > { %vm1264_vm2 = vcmp.ne.f32.partialorder %v2645_v33, %v5283_v52  ;;  %v1295_v19 = vsel %vm1263_vm1, %v3954_v8, 1e+09  ;;  %v2675_v21 = vunpack.i.h.bf16 %v2673_v49  ;;  %v2674_v35 = vunpack.i.l.bf16 %v2673_v49 }
 0x13e   : > { %v1356_v12 = vmin.f32 %v1354_v47, %v1355_v53  ;;  %v1296_v45 = vsel %vm1264_vm2, %v3964_v23, 1e+09  ;;  %v1368_v30 = vmin.f32 %v1295_v19, %v1299_v11  ;;  %v2650_v55 = vunpack.i.h.bf16 %v2648_v28 }
 0x13f   : > { %v1369_v41 = vmin.f32 %v1296_v45, %v1300_v17  ;;  %vm4391_vm3 = vcmp.ne.f32.partialorder %v2675_v21, %v5283_v52  ;;  %v2649_v5 = vunpack.i.l.bf16 %v2648_v28  ;;  %v1293_v0 = vsel %vm4358_vm13, %v3946_v1, 1e+09 }
 0x140   : > { %v2683_v40 = vpop.permute.xlu0 %2682  ;;  %v2658_v50 = vpop.permute.xlu1 %2657  ;;  %v1357_v46 = vrot.slane %v1356_v12, 4  ;;  %vm1275_vm4 = vcmp.ne.f32.partialorder %v2674_v35, %v5283_v52  ;;  %v1372_v47 = vmin.f32 %v1368_v30, %v1303_v14  ;;  %v1304_v36 = vsel %vm4379_vm0, %v3996_v54, 1e+09 }
 0x141   : > { %v1307_v48 = vsel %vm1275_vm4, %v4031_v25, 1e+09  ;;  %vm4404_vm5 = vcmp.ne.f32.partialorder %v2649_v5, %v5283_v52  ;;  %vm4409_vm6 = vcmp.ne.f32.partialorder %v2650_v55, %v5283_v52  ;;  %v1294_v42 = vsel %vm4363_vm14, %v3943_v38, 1e+09  ;;  %v4430_v55 = vpop.eup %2892 }
 0x142   : > { %v1358_v11 = vmin.f32 %v1356_v12, %v1357_v46  ;;  %v1308_v17 = vsel %vm4391_vm3, %v4034_v9, 1e+09  ;;  %v1373_v49 = vmin.f32 %v1369_v41, %v1304_v36  ;;  %v1376_v28 = vmin.f32 %v1372_v47, %v1307_v48 }
 0x143   : > { %v1297_v53 = vsel %vm4404_vm5, %v3973_v24, 1e+09  ;;  %v1298_v37 = vsel %vm4409_vm6, %v3976_v44, 1e+09  ;;  %v2685_v43 = vunpack.i.h.bf16 %v2683_v40  ;;  %v2684_v21 = vunpack.i.l.bf16 %v2683_v40 }
 0x144   : > { %v2693_v14 = vpop.permute.xlu0 %2692  ;;  %v2668_v19 = vpop.permute.xlu1 %2667  ;;  %v1359_v61 = vrot.slane %v1358_v11, 2  ;;  %v2660_v12 = vunpack.i.h.bf16 %v2658_v50  ;;  %v2659_v45 = vunpack.i.l.bf16 %v2658_v50  ;;  %v1377_v47 = vmin.f32 %v1373_v49, %v1308_v17  ;;  %v1325_v17 = vld [vmem:[#allocation2] sm:$0x1] }
 0x145   : > { %vm4426_vm7 = vcmp.ne.f32.partialorder %v2685_v43, %v5283_v52  ;;  %v2695_v35 = vunpack.i.h.bf16 %v2693_v14  ;;  %v2694_v41 = vunpack.i.l.bf16 %v2693_v14  ;;  %v2670_v20 = vunpack.i.h.bf16 %v2668_v19 }
 0x146   : > { %v1360_v5 = vmin.f32 %v1358_v11, %v1359_v61  ;;  %vm4433_vm8 = vcmp.ne.f32.partialorder %v2684_v21, %v5283_v52  ;;  %v1312_v40 = vsel %vm4426_vm7, %v4052_v26, 1e+09  ;;  %vm4441_vm9 = vcmp.ne.f32.partialorder %v2659_v45, %v5283_v52 }
 0x147   : > { %v1366_v36 = vmin.f32 %v1293_v0, %v1297_v53  ;;  %v1311_v48 = vsel %vm4433_vm8, %v4049_v3, 1e+09  ;;  %vm4449_vm10 = vcmp.ne.f32.partialorder %v2660_v12, %v5283_v52  ;;  %v1367_v14 = vmin.f32 %v1294_v42, %v1298_v37 }
 0x148   : > { %v2703_v16 = vpop.permute.xlu0 %2702  ;;  %v2678_v11 = vpop.permute.xlu1 %2677  ;;  %v1361_v43 = vrot.slane %v1360_v5, 1  ;;  %v1301_v61 = vsel %vm4441_vm9, %v3985_v39, 1e+09  ;;  %v1302_v0 = vsel %vm4449_vm10, %v3988_v27, 1e+09  ;;  %v1381_v49 = vmin.f32 %v1377_v47, %v1312_v40 }
 0x149   : > { %vm4460_vm11 = vcmp.ne.f32.partialorder %v2694_v41, %v5283_v52  ;;  %vm1284_vm12 = vcmp.ne.f32.partialorder %v2695_v35, %v5283_v52  ;;  %v2669_v21 = vunpack.i.l.bf16 %v2668_v19  ;;  %v1380_v42 = vmin.f32 %v1376_v28, %v1311_v48 }
 0x14a   : > { %v1362_v12 = vmin.f32 %v1360_v5, %v1361_v43  ;;  %v1316_v37 = vsel %vm1284_vm12, %v4066_v18, 1e+09  ;;  %vm4467_vm13 = vcmp.ne.f32.partialorder %v2670_v20, %v5283_v52  ;;  %v1370_v30 = vmin.f32 %v1366_v36, %v1301_v61 }
 0x14b   : > { %v1371_v46 = vmin.f32 %v1367_v14, %v1302_v0  ;;  %v1315_v41 = vsel %vm4460_vm11, %v4063_v2, 1e+09  ;;  %vm4475_vm14 = vcmp.ne.f32.partialorder %v2669_v21, %v5283_v52  ;;  %v1385_v5 = vmin.f32 %v1381_v49, %v1316_v37 }
 0x14c   : > { %v2713_v19 = vpop.permute.xlu0 %2712  ;;  %v2688_v28 = vpop.permute.xlu1 %2687  ;;  %v1363_v35 = vmin.f32 %v1325_v17, %v1362_v12  ;;  %v1306_v20 = vsel %vm4467_vm13, %v4027_v63, 1e+09  ;;  %v2705_v50 = vunpack.i.h.bf16 %v2703_v16  ;;  %v1305_v47 = vsel %vm4475_vm14, %v4024_v32, 1e+09 }
 0x14d   : > { %v2704_v36 = vunpack.i.l.bf16 %v2703_v16  ;;  %v2680_v48 = vunpack.i.h.bf16 %v2678_v11  ;;  %v2679_v33 = vunpack.i.l.bf16 %v2678_v11  ;;  %v2715_v43 = vunpack.i.h.bf16 %v2713_v19 }
 0x14e   : > { %1364 = vst [vmem:[#allocation2] sm:$0x1] %v1363_v35  ;;  %vm1288_vm15 = vcmp.ne.f32.partialorder %v2705_v50, %v5283_v52  ;;  %v2714_v14 = vunpack.i.l.bf16 %v2713_v19  ;;  %v2690_v61 = vunpack.i.h.bf16 %v2688_v28  ;;  %v1384_v49 = vmin.f32 %v1380_v42, %v1315_v41 }
 0x14f   : > { %vm1287_vm0 = vcmp.ne.f32.partialorder %v2704_v36, %v5283_v52  ;;  %v1320_v0 = vsel %vm1288_vm15, %v4084_v57, 1e+09  ;;  %vm4489_vm1 = vcmp.ne.f32.partialorder %v2679_v33, %v5283_v52  ;;  %vm4494_vm2 = vcmp.ne.f32.partialorder %v2680_v48, %v5283_v52 }
 0x150   : > { %v2698_v11 = vpop.permute.xlu1 %2697  ;;  %v1375_v53 = vmin.f32 %v1371_v46, %v1306_v20  ;;  %v1319_v21 = vsel %vm1287_vm0, %v4076_v7, 1e+09  ;;  %v1309_v12 = vsel %vm4489_vm1, %v4041_v15, 1e+09  ;;  %v1374_v45 = vmin.f32 %v1370_v30, %v1305_v47 }
 0x151   : > { %v2725_v37 = vpop.permute.xlu0 %2724  ;;  %v1389_v40 = vmin.f32 %v1385_v5, %v1320_v0  ;;  %v1310_v19 = vsel %vm4494_vm2, %v4046_v6, 1e+09  ;;  %vm4506_vm3 = vcmp.ne.f32.partialorder %v2714_v14, %v5283_v52  ;;  %v1388_v42 = vmin.f32 %v1384_v49, %v1319_v21 }
 0x152   : > { %vm4511_vm4 = vcmp.ne.f32.partialorder %v2715_v43, %v5283_v52  ;;  %v2689_v41 = vunpack.i.l.bf16 %v2688_v28  ;;  %vm4516_vm5 = vcmp.ne.f32.partialorder %v2690_v61, %v5283_v52  ;;  %v1378_v5 = vmin.f32 %v1374_v45, %v1309_v12 }
 0x153   : > { %v1323_v20 = vsel %vm4506_vm3, %v4185_v13, 1e+09  ;;  %v1324_v50 = vsel %vm4511_vm4, %v4332_v31, 1e+09  ;;  %v2700_v47 = vunpack.i.h.bf16 %v2698_v11  ;;  %v1379_v48 = vmin.f32 %v1375_v53, %v1310_v19 }
 0x154   : > { %v2708_v36 = vpop.permute.xlu1 %2707  ;;  %vm4527_vm6 = vcmp.ne.f32.partialorder %v2689_v41, %v5283_v52  ;;  %v1314_v33 = vsel %vm4516_vm5, %v4060_v22, 1e+09  ;;  %v2699_v43 = vunpack.i.l.bf16 %v2698_v11  ;;  %v2727_v17 = vunpack.i.h.bf16 %v2725_v37 }
 0x155   : > { %v2757_v14 = vpop.permute.xlu0 %2756  ;;  %v1313_v61 = vsel %vm4527_vm6, %v4057_v58, 1e+09  ;;  %vm4538_vm7 = vcmp.ne.f32.partialorder %v2700_v47, %v5283_v52  ;;  %v2726_v16 = vunpack.i.l.bf16 %v2725_v37  ;;  %v1392_v49 = vmin.f32 %v1388_v42, %v1323_v20 }
 0x156   : > { %v1393_v53 = vmin.f32 %v1389_v40, %v1324_v50  ;;  %vm4543_vm8 = vcmp.ne.f32.partialorder %v2699_v43, %v5283_v52  ;;  %v1318_v11 = vsel %vm4538_vm7, %v4073_v29, 1e+09  ;;  %v1383_v12 = vmin.f32 %v1379_v48, %v1314_v33 }
 0x157   : > { %v1317_v45 = vsel %vm4543_vm8, %v4070_v4, 1e+09  ;;  %vm1803_vm9 = vcmp.ne.f32.partialorder %v2726_v16, %v3951_v56  ;;  %vm1804_vm10 = vcmp.ne.f32.partialorder %v2727_v17, %v3951_v56  ;;  %v1382_v37 = vmin.f32 %v1378_v5, %v1313_v61 }
 0x158   : > { %v1835_v40 = vsel %vm1803_vm9, %v3954_v8, 1e+09  ;;  %v1836_v19 = vsel %vm1804_vm10, %v3964_v23, 1e+09  ;;  %v2710_v35 = vunpack.i.h.bf16 %v2708_v36  ;;  %v1387_v41 = vmin.f32 %v1383_v12, %v1318_v11 }
 0x159   : > { %v2773_v42 = vpop.permute.xlu0 %2772  ;;  %v4557_v46 = vpop.permute.xlu1 %2718  ;;  %v2709_v30 = vunpack.i.l.bf16 %v2708_v36  ;;  %v2759_v20 = vunpack.i.h.bf16 %v2757_v14  ;;  %v2758_v50 = vunpack.i.l.bf16 %v2757_v14  ;;  %v1386_v47 = vmin.f32 %v1382_v37, %v1317_v45 }
 0x15a   : > { %v2096_v48 = vmin.f32 %v1835_v40, %v1836_v19  ;;  %vm1290_vm11 = vcmp.ne.f32.partialorder %v2710_v35, %v5283_v52  ;;  %v2774_v28 = vunpack.i.l.bf16 %v2773_v42  ;;  %v1395_v16 = vmin.f32 %v1392_v49, %v1393_v53 }
 0x15b   : > { %vm1289_vm12 = vcmp.ne.f32.partialorder %v2709_v30, %v5283_v52  ;;  %v1322_v5 = vsel %vm1290_vm11, %v4129_v34, 1e+09  ;;  %vm1811_vm13 = vcmp.ne.f32.partialorder %v2758_v50, %v3951_v56  ;;  %vm1812_vm14 = vcmp.ne.f32.partialorder %v2759_v20, %v3951_v56 }
 0x15c   : > { %v1321_v33 = vsel %vm1289_vm12, %v4113_v51, 1e+09  ;;  %v1391_v43 = vmin.f32 %v1387_v41, %v1322_v5  ;;  %v1843_v36 = vsel %vm1811_vm13, %v3991_v60, 1e+09  ;;  %vm1813_vm15 = vcmp.ne.f32.partialorder %v2774_v28, %v3951_v56 }
 0x15d   : > { %v4566_v61 = vpop.permute.xlu1 %2729  ;;  %v1390_v14 = vmin.f32 %v1386_v47, %v1321_v33  ;;  %v2097_v0 = vmin.f32 %v1843_v36, %v2096_v48  ;;  %v1844_v17 = vsel %vm1812_vm14, %v3996_v54, 1e+09  ;;  %v2796_v52 = vpop.permute.xlu0 %2795  ;;  %v2775_v12 = vunpack.i.h.bf16 %v2773_v42 }
 0x15e   : > { %v1845_v45 = vsel %vm1813_vm15, %v4024_v32, 1e+09  ;;  %v2797_v19 = vunpack.i.l.bf16 %v2796_v52  ;;  %v2180_v53 = vadd.f32 1.0, %v4430_v55  ;;  %v2798_v48 = vunpack.i.h.bf16 %v2796_v52 }
 0x15f   : > { %v1394_v21 = vmin.f32 %v1390_v14, %v1391_v43  ;;  %v2100_v11 = vmin.f32 %v1844_v17, %v2097_v0  ;;  %vm1814_vm0 = vcmp.ne.f32.partialorder %v2775_v12, %v3951_v56  ;;  %v1365_v0 = vld [vmem:[#allocation3] sm:$0x1]  ;;  %vm2194_vm11 = vcmask 1040384  }
 0x160   : > { %vm1819_vm1 = vcmp.ne.f32.partialorder %v2797_v19, %v3951_v56  ;;  %v1846_v50 = vsel %vm1814_vm0, %v4027_v63, 1e+09  ;;  %2894 = vrcp.f32 %v2180_v53  ;;  %vm1820_vm2 = vcmp.ne.f32.partialorder %v2798_v48, %v3951_v56  ;;  %v2183_v53 = vld [vmem:[%s3572_s3 + $0x2] sm:$0x1]  ;;  %v2184_v48 = vld [vmem:[#allocation2] sm:$0x1] }
 0x161   : > { %v2735_v37 = vpop.permute.xlu1 %2734  ;;  %v1396_v40 = vmin.f32 %v1394_v21, %v1395_v16  ;;  %v2101_v41 = vmin.f32 %v1845_v45, %v2100_v11  ;;  %v2812_v49 = vpop.permute.xlu0 %2811  ;;  %v1851_v28 = vsel %vm1819_vm1, %v4049_v3, 1e+09  ;;  %v1852_v55 = vsel %vm1820_vm2, %v4052_v26, 1e+09 }
 0x162   : > { %v2813_v33 = vunpack.i.l.bf16 %v2812_v49  ;;  %v2814_v21 = vunpack.i.h.bf16 %v2812_v49  ;;  %vm2186_vm7 = vcmp.lt.f32.partialorder %v2184_v48, 1e+09 }
 0x163   : > { %v1397_v35 = vrot.slane %v1396_v40, 4  ;;  %v2104_v47 = vmin.f32 %v1846_v50, %v2101_v41  ;;  %v2737_v50 = vunpack.i.h.bf16 %v2735_v37 }
 0x164   : > { %vm1821_vm3 = vcmp.ne.f32.partialorder %v2813_v33, %v3951_v56  ;;  %vm1822_vm4 = vcmp.ne.f32.partialorder %v2814_v21, %v3951_v56  ;;  %v2187_v21 = vsel %vm2186_vm7, %v2184_v48, 0.0  ;;  %v2720_v48 = vunpack.i.l.bf16 %v4557_v46 }
 0x165   : > { %v1398_v30 = vmin.f32 %v1396_v40, %v1397_v35  ;;  %v2105_v14 = vmin.f32 %v1851_v28, %v2104_v47  ;;  %v1853_v12 = vsel %vm1821_vm3, %v4057_v58, 1e+09  ;;  %v2736_v40 = vunpack.i.l.bf16 %v2735_v37  ;;  %v2835_v49 = vpop.permute.xlu0 %2834 }
 0x166   : > { %v4573_v20 = vpop.permute.xlu1 %2740  ;;  %v1854_v35 = vsel %vm1822_vm4, %v4060_v22, 1e+09  ;;  %vm1808_vm6 = vcmp.ne.f32.partialorder %v2737_v50, %v3951_v56  ;;  %v2836_v33 = vunpack.i.l.bf16 %v2835_v49  ;;  %vm4629_vm15 = vcmp.ne.f32.partialorder %v2720_v48, %v3951_v56 }
 0x167   : > { %v1399_v42 = vrot.slane %v1398_v30, 2  ;;  %v2102_v52 = vmin.f32 %v1852_v55, %v2105_v14  ;;  %vm1807_vm5 = vcmp.ne.f32.partialorder %v2736_v40, %v3951_v56  ;;  %v1840_v37 = vsel %vm1808_vm6, %v3982_v62, 1e+09 }
 0x168   : > { %v1839_v47 = vsel %vm1807_vm5, %v3979_v10, 1e+09  ;;  %vm1827_vm8 = vcmp.ne.f32.partialorder %v2836_v33, %v3951_v56  ;;  %v1833_v33 = vsel %vm4629_vm15, %v3946_v1, 1e+09 }
 0x169   : > { %v1400_v5 = vmin.f32 %v1398_v30, %v1399_v42  ;;  %v2103_v45 = vmin.f32 %v1853_v12, %v2102_v52  ;;  %v2851_v14 = vpop.permute.xlu0 %2850  ;;  %v2837_v52 = vunpack.i.h.bf16 %v2835_v49 }
 0x16a   : > { %v4578_v43 = vpop.permute.xlu1 %2745  ;;  %v2852_v50 = vunpack.i.l.bf16 %v2851_v14 }
 0x16b   : > { %v1401_v36 = vrot.slane %v1400_v5, 1  ;;  %v2106_v30 = vmin.f32 %v1854_v35, %v2103_v45  ;;  %v2731_v45 = vunpack.i.l.bf16 %v4566_v61  ;;  %v1859_v35 = vsel %vm1827_vm8, %v4076_v7, 1e+09 }
 0x16c   : > { %vm1828_vm12 = vcmp.ne.f32.partialorder %v2837_v52, %v3951_v56  ;;  %v5334_v52 = vld [vmem:[#allocation28_spill] sm:$0xff]  ;;  %vm4622_vm14 = vcmp.ne.f32.partialorder %v2852_v50, %v3951_v56  ;;  %v2748_v50 = vunpack.i.h.bf16 %v4578_v43 }
 0x16d   : > { %v1402_v17 = vmin.f32 %v1400_v5, %v1401_v36  ;;  %v2895_v41 = vpop.eup %2894  ;;  %v2107_v5 = vmin.f32 %v1839_v47, %v2106_v30  ;;  %v2721_v47 = vunpack.i.h.bf16 %v4557_v46  ;;  %vm4611_vm13 = vcmp.ne.f32.partialorder %v2731_v45, %v3951_v56 }
 0x16e   : > { %v2191_v28 = vsub.f32 %v2895_v41, %v2183_v53  ;;  %v2857_v53 = vpop.permute.xlu0 %2856 }
 0x16f   : > { %v1403_v16 = vmin.f32 %v1365_v0, %v1402_v17  ;;  %v1633_v17 = vld [vmem:[%s3572_s3 + $0x3] sm:$0x1]  ;;  %vm4634_vm0 = vcmp.ne.f32.partialorder %v2721_v47, %v3951_v56 }
 0x170   : > { %v4583_v11 = vpop.permute.xlu1 %2751  ;;  %v2192_v55 = vmul.f32 %v2191_v28, %v2191_v28  ;;  %vm1634_vm10 = vcmp.gt.f32.partialorder %v1633_v17, 0.5  ;;  %v2732_v28 = vunpack.i.h.bf16 %v4566_v61  ;;  %v1860_v17 = vsel %vm1828_vm12, %v4084_v57, 1e+09 }
 0x171   : > { %1404 = vst [vmem:[#allocation3] sm:$0x1] %v1403_v16  ;;  %v2108_v16 = vmin.f32 %v1840_v37, %v2107_v5  ;;  %v2474_v5 = vsel %vm1634_vm10, 1.0, %v5137_v59  ;;  %v2858_v61 = vunpack.i.l.bf16 %v2857_v53 }
 0x172   : > { %v4619_v46 = vrot.slane %v2474_v5, %v5334_v52  ;;  %vm4639_vm1 = vcmp.ne.f32.partialorder %v2732_v28, %v3951_v56  ;;  %v2862_v47 = vpop.permute.xlu0 %2861  ;;  %v1861_v28 = vsel %vm4622_vm14, %v4113_v51, 1e+09  ;;  %v2747_v5 = vunpack.i.l.bf16 %v4578_v43 }
 0x173   : > { %v2109_v30 = vmin.f32 %v1859_v35, %v2108_v16  ;;  %v2743_v35 = vunpack.i.h.bf16 %v4573_v20  ;;  %v1838_v43 = vsel %vm4639_vm1, %v3976_v44, 1e+09 }
 0x174   : > { %vm4667_vm4 = vcmp.ne.f32.partialorder %v2858_v61, %v4619_v46  ;;  %vm4697_vm7 = vcmp.ne.f32.partialorder %v2748_v50, %v4619_v46  ;;  %vm4702_vm8 = vcmp.ne.f32.partialorder %v2747_v5, %v4619_v46 }
 0x175   : > { %v4587_v19 = vpop.permute.xlu1 %2762  ;;  %v2112_v16 = vmin.f32 %v1860_v17, %v2109_v30  ;;  %v2742_v30 = vunpack.i.l.bf16 %v4573_v20  ;;  %v2859_v20 = vunpack.i.h.bf16 %v2857_v53  ;;  %v2754_v17 = vunpack.i.h.bf16 %v4583_v11 }
 0x176   : > { %vm4689_vm6 = vcmp.ne.f32.partialorder %v2743_v35, %v4619_v46  ;;  %v2864_v35 = vunpack.i.h.bf16 %v2862_v47  ;;  %v2867_v48 = vpop.permute.xlu0 %2866 }
 0x177   : > { %vm4684_vm5 = vcmp.ne.f32.partialorder %v2742_v30, %v4619_v46  ;;  %vm4715_vm10 = vcmp.ne.f32.partialorder %v2754_v17, %v3951_v56  ;;  %v2863_v17 = vunpack.i.l.bf16 %v2862_v47 }
 0x178   : > { %v2185_v36 = vld [vmem:[#allocation3] sm:$0x1]  ;;  %vm4743_vm12 = vcmp.ne.f32.partialorder %v2864_v35, %v4619_v46 }
 0x179   : > { %v4592_v42 = vpop.permute.xlu1 %2767  ;;  %vm2188_vm9 = vcmp.lt.f32.partialorder %v2185_v36, 1e+09 }
 0x17a   : > { %v2189_v12 = vsel %vm2188_vm9, %v2185_v36, 0.0  ;;  %v2753_v36 = vunpack.i.l.bf16 %v4583_v11  ;;  %vm4707_vm9 = vcmp.ne.f32.partialorder %v2859_v20, %v4619_v46  ;;  %v2765_v20 = vunpack.i.h.bf16 %v4587_v19 }
 0x17b   : > { %v2190_v40 = vadd.f32 %v2189_v12, %v2187_v21  ;;  %v2770_v59 = vunpack.i.h.bf16 %v4592_v42  ;;  %v2872_v12 = vpop.permute.xlu0 %2871  ;;  %v2769_v50 = vunpack.i.l.bf16 %v4592_v42 }
 0x17c   : > { %vm4650_vm2 = vcmp.ne.f32.partialorder %v2753_v36, %v3951_v56  ;;  %v2113_v36 = vmin.f32 %v1861_v28, %v2112_v16  ;;  %vm4758_vm15 = vcmp.ne.f32.partialorder %v2765_v20, %v4619_v46 }
 0x17d   : > { %v2193_v49 = vmul.f32 %v2192_v55, %v2190_v40  ;;  %v2853_v55 = vunpack.i.h.bf16 %v2851_v14  ;;  %v1837_v40 = vsel %vm4611_vm13, %v3973_v24, 1e+09  ;;  %v1841_v16 = vsel %vm4650_vm2, %v3985_v39, 1e+09 }
 0x17e   : > { %v4596_v0 = vpop.permute.xlu1 %2778  ;;  %v2094_v53 = vmin.f32 %v1833_v33, %v1837_v40  ;;  %v2061_v40 = vsel %vm4667_vm4, %v3946_v1, 1e+09  ;;  %v2764_v33 = vunpack.i.l.bf16 %v4587_v19  ;;  %v2063_v1 = vsel %vm4684_vm5, %v3954_v8, 1e+09 }
 0x17f   : > { %v2195_v37 = vsel %vm2194_vm11, %v2193_v49, 0.0  ;;  %vm4655_vm3 = vcmp.ne.f32.partialorder %v2853_v55, %v3951_v56  ;;  %v1834_v55 = vsel %vm4634_vm0, %v3943_v38, 1e+09  ;;  %v2780_v28 = vunpack.i.l.bf16 %v4596_v0 }
 0x180   : > { %2196 = vadd.xlane.f32.xlu1 %v2195_v37  ;;  %v1862_v61 = vsel %vm4655_vm3, %v4129_v34, 1e+09  ;;  %v2098_v49 = vmin.f32 %v2094_v53, %v1841_v16  ;;  %v2095_v5 = vmin.f32 %v1834_v55, %v1838_v43  ;;  %v2065_v37 = vsel %vm4702_vm8, %v3973_v24, 1e+09 }
 0x181   : > { %v2110_v30 = vmin.f32 %v1862_v61, %v2113_v36  ;;  %v2064_v36 = vsel %vm4689_vm6, %v3964_v23, 1e+09  ;;  %v2066_v55 = vsel %vm4697_vm7, %v3976_v44, 1e+09  ;;  %v2062_v19 = vsel %vm4707_vm9, %v3943_v38, 1e+09 }
 0x182   : > { %v2134_v43 = vmin.f32 %v2061_v40, %v2065_v37  ;;  %v1842_v8 = vsel %vm4715_vm10, %v3988_v27, 1e+09  ;;  %v2868_v24 = vunpack.i.l.bf16 %v2867_v48  ;;  %vm4748_vm13 = vcmp.ne.f32.partialorder %v2780_v28, %v3951_v56 }
 0x183   : > { %v4603_v41 = vpop.permute.xlu1 %2784  ;;  %v2111_v53 = vmin.f32 %v2098_v49, %v2110_v30  ;;  %vm4753_vm14 = vcmp.ne.f32.partialorder %v2764_v33, %v4619_v46  ;;  %v2869_v16 = vunpack.i.h.bf16 %v2867_v48  ;;  %v2099_v11 = vmin.f32 %v2095_v5, %v1842_v8 }
 0x184   : > { %vm4764_vm0 = vcmp.ne.f32.partialorder %v2863_v17, %v4619_v46  ;;  %v2781_v14 = vunpack.i.h.bf16 %v4596_v0  ;;  %v2135_v35 = vmin.f32 %v2062_v19, %v2066_v55  ;;  %v2068_v30 = vsel %vm4743_vm12, %v3982_v62, 1e+09 }
 0x185   : > { %v1847_v49 = vsel %vm4748_vm13, %v4031_v25, 1e+09  ;;  %v2114_v48 = vmin.f32 %v2099_v11, %v2111_v53  ;;  %v2069_v0 = vsel %vm4753_vm14, %v3985_v39, 1e+09  ;;  %v2070_v28 = vsel %vm4758_vm15, %v3988_v27, 1e+09 }
 0x186   : > { %vm4786_vm1 = vcmp.ne.f32.partialorder %v2868_v24, %v4619_v46  ;;  %v2067_v62 = vsel %vm4764_vm0, %v3979_v10, 1e+09  ;;  %vm4794_vm2 = vcmp.ne.f32.partialorder %v2869_v16, %v4619_v46  ;;  %vm4799_vm3 = vcmp.ne.f32.partialorder %v2770_v59, %v4619_v46 }
 0x187   : > { %v2874_v27 = vunpack.i.h.bf16 %v2872_v12  ;;  %v2137_v20 = vmin.f32 %v2064_v36, %v2068_v30  ;;  %vm4804_vm4 = vcmp.ne.f32.partialorder %v2781_v14, %v3951_v56  ;;  %v2115_v37 = vmin.f32 %v1847_v49, %v2114_v48  ;;  %v2883_v14 = vpop.permute.xlu0 %2882 }
 0x188   : > { %v4626_v21 = vpop.permute.xlu1 %2790  ;;  %v2138_v17 = vmin.f32 %v2134_v43, %v2069_v0  ;;  %v2139_v55 = vmin.f32 %v2135_v35, %v2070_v28  ;;  %v2073_v19 = vsel %vm4786_vm1, %v4024_v32, 1e+09  ;;  %vm4817_vm6 = vcmp.ne.f32.partialorder %v2769_v50, %v4619_v46  ;;  %v2206_v0 = vld [vmem:[%s3572_s3 + $0x1] sm:$0x1] }
 0x189   : > { %v2792_v45 = vunpack.i.l.bf16 %v4626_v21  ;;  %v2074_v53 = vsel %vm4794_vm2, %v4027_v63, 1e+09  ;;  %v2072_v43 = vsel %vm4799_vm3, %v3996_v54, 1e+09  ;;  %v2793_v23 = vunpack.i.h.bf16 %v4626_v21 }
 0x18a   : > { %v2873_v32 = vunpack.i.l.bf16 %v2872_v12  ;;  %vm4832_vm7 = vcmp.ne.f32.partialorder %v2874_v27, %v4619_v46  ;;  %v1848_v38 = vsel %vm4804_vm4, %v4034_v9, 1e+09  ;;  %v2071_v54 = vsel %vm4817_vm6, %v3991_v60, 1e+09 }
 0x18b   : > { %vm4809_vm5 = vcmp.ne.f32.partialorder %v2792_v45, %v3951_v56  ;;  %v2118_v21 = vmin.f32 %v1848_v38, %v2115_v37  ;;  %v2136_v59 = vmin.f32 %v2063_v1, %v2067_v62  ;;  %v2142_v11 = vmin.f32 %v2138_v17, %v2073_v19 }
 0x18c   : > { %v1849_v63 = vsel %vm4809_vm5, %v4041_v15, 1e+09  ;;  %v2143_v61 = vmin.f32 %v2139_v55, %v2074_v53  ;;  %v2141_v12 = vmin.f32 %v2137_v20, %v2072_v43  ;;  %v2786_v45 = vunpack.i.l.bf16 %v4603_v41 }
 0x18d   : > { %v4681_v52 = vpop.permute.xlu1 %2801  ;;  %vm4849_vm8 = vcmp.ne.f32.partialorder %v2793_v23, %v3951_v56  ;;  %v2119_v30 = vmin.f32 %v1849_v63, %v2118_v21  ;;  %vm4859_vm10 = vcmp.ne.f32.partialorder %v2873_v32, %v4619_v46  ;;  %v2082_v49 = vsel %vm4832_vm7, %v4060_v22, 1e+09 }
 0x18e   : > { %v2804_v44 = vunpack.i.h.bf16 %v4681_v52  ;;  %v2803_v16 = vunpack.i.l.bf16 %v4681_v52  ;;  %v2140_v52 = vmin.f32 %v2136_v59, %v2071_v54  ;;  %v2787_v48 = vunpack.i.h.bf16 %v4603_v41 }
 0x18f   : > { %v2885_v39 = vunpack.i.h.bf16 %v2883_v14  ;;  %v2884_v27 = vunpack.i.l.bf16 %v2883_v14  ;;  %v1850_v22 = vsel %vm4849_vm8, %v4046_v6, 1e+09  ;;  %vm4886_vm14 = vcmp.ne.f32.partialorder %v2786_v45, %v4619_v46 }
 0x190   : > { %vm4869_vm12 = vcmp.ne.f32.partialorder %v2803_v16, %v4619_v46  ;;  %vm4874_vm13 = vcmp.ne.f32.partialorder %v2804_v44, %v4619_v46  ;;  %v2122_v33 = vmin.f32 %v1850_v22, %v2119_v30  ;;  %v2081_v10 = vsel %vm4859_vm10, %v4057_v58, 1e+09 }
 0x191   : > { %v4722_v31 = vpop.permute.xlu1 %2806  ;;  %vm4895_vm15 = vcmp.ne.f32.partialorder %v2787_v48, %v4619_v46  ;;  %v2077_v55 = vsel %vm4869_vm12, %v4041_v15, 1e+09  ;;  %v2078_v19 = vsel %vm4874_vm13, %v4046_v6, 1e+09  ;;  %vm4917_vm2 = vcmp.ne.f32.partialorder %v2884_v27, %v4619_v46  ;;  %v2213_v48 = vld [vmem:[%s3572_s3 + $0x3] sm:$0x1] }
 0x192   : > { %v2808_v37 = vunpack.i.l.bf16 %v4722_v31  ;;  %v2809_v53 = vunpack.i.h.bf16 %v4722_v31  ;;  %vm4922_vm3 = vcmp.ne.f32.partialorder %v2885_v39, %v4619_v46  ;;  %v2075_v31 = vsel %vm4886_vm14, %v4031_v25, 1e+09  ;;  %s2251_s3 = sshll.u32 %s162_s30, 4  ;;  %s2252_s3 = int_to_ptr.vmem [resolvable:$true] %s2251_s3 }
 0x193   : > { %v2146_v38 = vmin.f32 %v2142_v11, %v2077_v55  ;;  %v2147_v21 = vmin.f32 %v2143_v61, %v2078_v19  ;;  %v2076_v11 = vsel %vm4895_vm15, %v4034_v9, 1e+09  ;;  %v2144_v14 = vmin.f32 %v2140_v52, %v2075_v31  ;;  %s2900_s16 = scalar_lea.vmem %s2252_s3, 128  ;;  %p2907_p1 = scmp.lt.s32.totalorder %s2252_s3, %s2905_s18 }
 0x194   : > { %vm4931_vm4 = vcmp.ne.f32.partialorder %v2808_v37, %v4619_v46  ;;  %vm4946_vm5 = vcmp.ne.f32.partialorder %v2809_v53, %v4619_v46  ;;  %v2145_v1 = vmin.f32 %v2141_v12, %v2076_v11  ;;  %p2901_p12 = scmp.ne.s32.totalorder %s2252_s3, %s2900_s16  ;;  %p2908_p2 = scmp.lt.s32.totalorder %s2906_s20, %s2900_s16 }
 0x195   : > { %v2151_v28 = vmin.f32 %v2147_v21, %v2082_v49  ;;  %v2080_v5 = vsel %vm4946_vm5, %v4052_v26, 1e+09 }
 0x196   : > { %v4770_v40 = vpop.permute.xlu1 %2817  ;;  %p2902_p13 = pnand %p2901_p12, %p3042_p4  ;;  %p2909_p3 = por %p2908_p2, %p2907_p1 }
 0x197   : > { %v2819_v24 = vunpack.i.l.bf16 %v4770_v40  ;;  %v2820_v62 = vunpack.i.h.bf16 %v4770_v40  ;;  %v2476_v40 = vmul.f32 -1.442695, %v2206_v0  ;;  %v2150_v0 = vmin.f32 %v2146_v38, %v2081_v10 }
 0x198   : > { %v2149_v10 = vmin.f32 %v2145_v1, %v2080_v5  ;;  %p2903_p0 = pneg %p2902_p13 }
 0x199   : > { %vm4854_vm9 = vcmp.ne.f32.partialorder %v2819_v24, %v3951_v56  ;;  %vm4907_vm0 = vcmp.ne.f32.partialorder %v2820_v62, %v3951_v56  ;;  %2896 = vpow2.f32 %v2476_v40  ;;  %v2090_v40 = vsel %vm4922_vm3, %v4129_v34, 1e+09 }
 0x19a   : > { %v1855_v41 = vsel %vm4854_vm9, %v4063_v2, 1e+09  ;;  %v1856_v44 = vsel %vm4907_vm0, %v4066_v18, 1e+09  ;;  %p2910_p5 = pnand %p2909_p3, %p2903_p0 }
 0x19b   : > { %v4821_v8 = vpop.permute.xlu1 %2823  ;;  %v2116_v58 = vmin.f32 %v1855_v41, %v2122_v33 }
 0x19c   : > { %v2825_v24 = vunpack.i.l.bf16 %v4821_v8  ;;  %v2826_v16 = vunpack.i.h.bf16 %v4821_v8  ;;  %v2079_v8 = vsel %vm4931_vm4, %v4049_v3, 1e+09 }
 0x19d   : > { %v2117_v61 = vmin.f32 %v1856_v44, %v2116_v58  ;;  %v2148_v62 = vmin.f32 %v2144_v14, %v2079_v8  ;;  %v2093_v8 = vld [vmem:[#allocation2 + $0x1] sm:$0x1] }
 0x19e   : > { %vm4954_vm6 = vcmp.ne.f32.partialorder %v2825_v24, %v4619_v46  ;;  %vm4974_vm10 = vcmp.ne.f32.partialorder %v2826_v16, %v4619_v46 }
 0x19f   : > { %v2083_v27 = vsel %vm4954_vm6, %v4063_v2, 1e+09  ;;  %v2084_v41 = vsel %vm4974_vm10, %v4066_v18, 1e+09  ;;  %v2089_v18 = vsel %vm4917_vm2, %v4113_v51, 1e+09 }
 0x1a0   : > { %v2830_v50 = vpop.permute.xlu1 %2829  ;;  %v2152_v55 = vmin.f32 %v2148_v62, %v2083_v27  ;;  %v2153_v43 = vmin.f32 %v2149_v10, %v2084_v41  ;;  %v5427_v51 = vld [vmem:[#allocation16_spill] sm:$0xff] }
 0x1a1   : > { %v2831_v42 = vunpack.i.l.bf16 %v2830_v50  ;;  %v2832_v54 = vunpack.i.h.bf16 %v2830_v50 }
 0x1a3   : > { %vm4912_vm1 = vcmp.ne.f32.partialorder %v2831_v42, %v3951_v56  ;;  %vm4969_vm9 = vcmp.ne.f32.partialorder %v2832_v54, %v3951_v56 }
 0x1a4   : > { %v1857_v25 = vsel %vm4912_vm1, %v4070_v4, 1e+09  ;;  %v1858_v49 = vsel %vm4969_vm9, %v4073_v29, 1e+09 }
 0x1a5   : > { %v2120_v3 = vmin.f32 %v1857_v25, %v2117_v61 }
 0x1a6   : > { %v2841_v36 = vpop.permute.xlu1 %2840  ;;  %v2897_v15 = vpop.eup %2896 }
 0x1a7   : > { %v2843_v32 = vunpack.i.h.bf16 %v2841_v36  ;;  %v2842_v47 = vunpack.i.l.bf16 %v2841_v36  ;;  %v2210_v11 = vadd.f32 1.0, %v2897_v15 }
 0x1a9   : > { %vm4959_vm7 = vcmp.ne.f32.partialorder %v2842_v47, %v4619_v46  ;;  %vm4964_vm8 = vcmp.ne.f32.partialorder %v2843_v32, %v4619_v46  ;;  %2898 = vrcp.f32 %v2210_v11 }
 0x1aa   : > { %v2846_v59 = vpop.permute.xlu1 %2845  ;;  %v2085_v42 = vsel %vm4959_vm7, %v4070_v4, 1e+09  ;;  %v2086_v12 = vsel %vm4964_vm8, %v4073_v29, 1e+09  ;;  %v2121_v4 = vmin.f32 %v1858_v49, %v2120_v3  ;;  %v2133_v3 = vld [vmem:[#allocation3 + $0x1] sm:$0x1] }
 0x1ab   : > { %v2848_v50 = vunpack.i.h.bf16 %v2846_v59  ;;  %v2847_v52 = vunpack.i.l.bf16 %v2846_v59  ;;  %v2154_v2 = vmin.f32 %v2150_v0, %v2085_v42  ;;  %v2155_v37 = vmin.f32 %v2151_v28, %v2086_v12 }
 0x1ad   : > { %vm4997_vm12 = vcmp.ne.f32.partialorder %v2847_v52, %v4619_v46  ;;  %vm5002_vm13 = vcmp.ne.f32.partialorder %v2848_v50, %v4619_v46  ;;  %v2158_v6 = vmin.f32 %v2154_v2, %v2089_v18  ;;  %v2159_v31 = vmin.f32 %v2155_v37, %v2090_v40 }
 0x1ae   : > { %v2087_v19 = vsel %vm4997_vm12, %v4076_v7, 1e+09 }
 0x1af   : > { %v2878_v39 = vpop.permute.xlu1 %2877  ;;  %v2156_v32 = vmin.f32 %v2152_v55, %v2087_v19  ;;  %v2162_v44 = vmin.f32 %v2158_v6, %v2159_v31 }
 0x1b0   : > { %v2880_v22 = vunpack.i.h.bf16 %v2878_v39  ;;  %v2879_v26 = vunpack.i.l.bf16 %v2878_v39 }
 0x1b2   : > { %vm1831_vm14 = vcmp.ne.f32.partialorder %v2879_v26, %v3951_v56  ;;  %vm5008_vm15 = vcmp.ne.f32.partialorder %v2880_v22, %v3951_v56  ;;  %v2088_v56 = vsel %vm5002_vm13, %v4084_v57, 1e+09 }
 0x1b3   : > { %v1863_v17 = vsel %vm1831_vm14, %v4185_v13, 1e+09  ;;  %v1864_v58 = vsel %vm5008_vm15, %v5427_v51, 1e+09  ;;  %v2157_v47 = vmin.f32 %v2153_v43, %v2088_v56 }
 0x1b4   : > { %v2123_v36 = vmin.f32 %v1863_v17, %v2121_v4  ;;  %v2889_v53 = vpop.permute.xlu1 %2888 }
 0x1b5   : > { %v2891_v34 = vunpack.i.h.bf16 %v2889_v53  ;;  %v2890_v23 = vunpack.i.l.bf16 %v2889_v53 }
 0x1b6   : > { %v2124_v24 = vmin.f32 %v1864_v58, %v2123_v36  ;;  %v2899_v1 = vpop.eup %2898 }
 0x1b7   : > { %vm2059_vm0 = vcmp.ne.f32.partialorder %v2890_v23, %v4619_v46  ;;  %vm2060_vm1 = vcmp.ne.f32.partialorder %v2891_v34, %v4619_v46  ;;  %v2221_v28 = vsub.f32 %v2899_v1, %v2213_v48 }
 0x1b8   : > { %v2125_v7 = vrot.slane %v2124_v24, 4  ;;  %v2091_v57 = vsel %vm2059_vm0, %v4185_v13, 1e+09  ;;  %v2092_v38 = vsel %vm2060_vm1, %v5427_v51, 1e+09 }
 0x1b9   : > { %v2160_v63 = vmin.f32 %v2156_v32, %v2091_v57  ;;  %v2161_v54 = vmin.f32 %v2157_v47, %v2092_v38  ;;  %v2222_v62 = vmul.f32 %v2221_v28, %v2221_v28 }
 0x1ba   : > { %v2126_v21 = vmin.f32 %v2124_v24, %v2125_v7 }
 0x1bb   : > { %v2163_v16 = vmin.f32 %v2160_v63, %v2161_v54 }
 0x1bc   : > { %v2127_v25 = vrot.slane %v2126_v21, 2 }
 0x1bd   : > { %v2164_v59 = vmin.f32 %v2162_v44, %v2163_v16 }
 0x1be   : > { %v2128_v14 = vmin.f32 %v2126_v21, %v2127_v25 }
 0x1bf   : > { %v2165_v45 = vrot.slane %v2164_v59, 4 }
 0x1c0   : > { %v2129_v61 = vrot.slane %v2128_v14, 1 }
 0x1c1   : > { %v2166_v35 = vmin.f32 %v2164_v59, %v2165_v45 }
 0x1c2   : > { %v2130_v46 = vmin.f32 %v2128_v14, %v2129_v61 }
 0x1c3   : > { %v2167_v30 = vrot.slane %v2166_v35, 2 }
 0x1c4   : > { %v2131_v13 = vmin.f32 %v2093_v8, %v2130_v46 }
 0x1c5   : > { %v2168_v9 = vmin.f32 %v2166_v35, %v2167_v30 }
 0x1c6   : > { %2132 = vst [vmem:[#allocation2 + $0x1] sm:$0x1] %v2131_v13 }
 0x1c7   : > { %v2169_v60 = vrot.slane %v2168_v9, 1 }
 0x1c9   : > { %v2170_v50 = vmin.f32 %v2168_v9, %v2169_v60 }
 0x1cb   : > { %v2171_v52 = vmin.f32 %v2133_v3, %v2170_v50 }
 0x1cd   : > { %2172 = vst [vmem:[#allocation3 + $0x1] sm:$0x1] %v2171_v52  ;;  %v2214_v0 = vld [vmem:[#allocation2 + $0x1] sm:$0x1] }
 0x1ce   : > { %vm2216_vm2 = vcmp.lt.f32.partialorder %v2214_v0, 1e+09 }
 0x1cf   : > { %v2217_v42 = vsel %vm2216_vm2, %v2214_v0, 0.0 }
 0x1d4   : > { %v2215_v5 = vld [vmem:[#allocation3 + $0x1] sm:$0x1] }
 0x1d5   : > { %vm2218_vm3 = vcmp.lt.f32.partialorder %v2215_v5, 1e+09 }
 0x1d6   : > { %v2219_v12 = vsel %vm2218_vm3, %v2215_v5, 0.0 }
 0x1d7   : > { %v2220_v39 = vadd.f32 %v2219_v12, %v2217_v42 }
 0x1d9   : > { %v2223_v27 = vmul.f32 %v2222_v62, %v2220_v39 }
 0x1db   : > { %v2224_v49 = vsel %vm2194_vm11, %v2223_v27, 0.0 }
 0x1dc   : > { %2225 = vadd.xlane.f32.xlu0 %v2224_v49 }
 0x209   : > { %v2197_v22 = vpop.xlane.xlu1 %2196 }
 0x20a   : > { %v2198_v26 = vrot.slane %v2197_v22, 4 }
 0x20c   : > { %v2199_v41 = vadd.f32 %v2198_v26, %v2197_v22 }
 0x20e   : > { %v2200_v4 = vrot.slane %v2199_v41, 2 }
 0x210   : > { %v2201_v20 = vadd.f32 %v2200_v4, %v2199_v41 }
 0x212   : > { %v2202_v33 = vrot.slane %v2201_v20, 1 }
 0x214   : > { %v2203_v2 = vadd.f32 %v2202_v33, %v2201_v20 }
 0x216   : > { %2481 = vpush %v2203_v2 }
 0x247   : > { %s2482_s29 = spop %2481 }
 0x265   : > { %v2226_v37 = vpop.xlane.xlu0 %2225 }
 0x266   : > { %v2227_v29 = vrot.slane %v2226_v37, 4 }
 0x268   : > { %v2228_v18 = vadd.f32 %v2227_v29, %v2226_v37 }
 0x26a   : > { %v2229_v40 = vrot.slane %v2228_v18, 2 }
 0x26c   : > { %v2230_v10 = vadd.f32 %v2229_v40, %v2228_v18 }
 0x26e   : > { %v2231_v17 = vrot.slane %v2230_v10, 1 }
 0x270   : > { %v2232_v55 = vadd.f32 %v2231_v17, %v2230_v10 }
 0x272   : > { %2483 = vpush %v2232_v55 }
 0x2a3   : > { %s2484_s4 = spop %2483 }
 0x2a4   : > { %s2234_s5 = sadd.f32 %s2484_s4, %s2482_s29 }
 0x2a6   : > { %v2235_v19 = vstv %s2234_s5 }
 0x2a7   : > { %2236 = vst [vmem:[%s162_s30] sm:$0xff] %v2235_v19 }
 0x2a8   : > { %2913 = shalt.err (!%p2910_p5)
}
 0x2a9   : > { %s2914_s23 = scalar_lea.hbm %s5039_s8, 128  ;;  %s2918_s26 = scalar_lea.hbm %s5081_s2, 256 }
 0x2aa   : > { %p2915_p6 = scmp.ne.s32.totalorder %s5039_s8, %s2914_s23  ;;  %p2919_p10 = scmp.lt.s32.totalorder %s5039_s8, %s5081_s2 }
 0x2ab   : > { %p2920_p11 = scmp.lt.s32.totalorder %s2918_s26, %s2914_s23 }
 0x2ac   : > { %p2916_p7 = pnand %p2915_p6, %p3042_p4 }
 0x2ad   : > { %p2921_p12 = por %p2920_p11, %p2919_p10 }
 0x2ae   : > { %p2917_p9 = pneg %p2916_p7 }
 0x2b0   : > { %p2922_p13 = pnand %p2921_p12, %p2917_p9 }
 0x2b2   : > { %2925 = shalt.err (!%p2922_p13)
}
 0x2b3   : > { %2485 = dma.vmem_to_hbm [thread:$0]  (%p3042_p4), %s2252_s3, 128, %s5039_s8, %s2238_s15  }
 0x2b4 PF: > { %p2491_p0 = scmp.ge.s32.totalorder %s2976_s14, 2  ;;  %s2263_s29 = sand.u32 1, %s2956_s9  }
 0x2b5   : > { %s2264_s30 = scalar_lea.sflag [#allocation5], %s2263_s29 }
 0x2b6   : > { %p2488_p1 = pnand %p2491_p0, %p3049_p8 }
 0x2b8   : > { %p2489_p2 = pneg %p2488_p1 }
 0x2ba   : > { %2951 = dma.done.wait (%p2489_p2), %s2264_s30, 128  }
 0x2bb   : > { %2953 = vsyncadd (%p2489_p2), %s2264_s30, 4294967168  ;;  %s15_s14 = sadd.s32 1, %s2976_s14   ;;  %s5428_s9 = smov %s2960_s10 }
 0x2bc   : > { %p12_p3 = scmp.ge.s32.totalorder %s15_s14, 4   ;;  %s5429_s10 = smov %s2964_s11 }
 0x2bd   : > { %s5430_s11 = smov %s3055_s22  ;;  %s5431_s12 = smov %s2972_s13 }
 0x2be   : > { %s5432_s13 = smov %s5434_s17  ;;  %14 = sbr.rel (!%p12_p3) target bundleno = 4 (0x4), region = 74 }
 0x2c3   :  { %2269 = vsyncpa [#allocation5], 1 }
 0x2c4   :  { %2271 = vsyncpa [#allocation5 + $0x1], 1 }

</bundles_post_ra>
